<compile_context>
chip_gen: v7x
topology: tpu7x:2x2x1
jax: 0.10.0
libtpu: 0.0.40
codegen_flags: <defaults>
</compile_context>

<pallas_src>
import jax
import jax.numpy as jnp
from jax.experimental import pallas as pl
from jax.experimental.pallas import tpu as pltpu

# ----------------------------- model configuration -----------------------------
B, S = 2, 8            # batch, seq_len
BS = B * S             # flattened batch*seq rows, processed in ONE kernel call
TITLE_EMB = 32         # title_emb_size
HID = 16               # hidden_size
D = 2 * HID            # transformer d_model = hidden_size * 2
NH = 2                 # nhead
HD = D // NH           # head dim
FF = HID               # dim_feedforward = hidden_size
API_DIM = 200
TTYPE = 5              # ttype_len
NLAYERS = 2
VOCAB = 50

IN_DIM = TITLE_EMB + API_DIM   # fused input feature width (title ++ API)
OUT_PAD = 128                  # lane-dense output width (sliced to TTYPE on the host)

# row offsets inside the packed (MS_ROWS, 128) slab (all 8-aligned)
R_WIN = 0                      # fused [translate_titleemb; translate_APIemb] weight (IN_DIM rows)
R_WCL = R_WIN + IN_DIM         # linear_class weight                                  (D rows)
R_WEFF = R_WCL + D             # fused logits_layer_cla weight                        (HID rows)
R_MISC = R_WEFF + HID          # misc bias rows: [0]=b_in, [1]=b_cl, [2]=b_eff        (8 rows)
R_SEG = R_MISC + 8             # (BS, BS) same-batch 0/1 indicator (pooling denominator)
R_AMASK = R_SEG + BS           # (BS, BS) precomputed additive score mask: 0 / -1e30
R_LYR = R_AMASK + BS           # per-layer lane-dense weight block (LYR_ROWS rows / layer)

# per-layer sub-offsets inside a layer block
O_QKV = 0                      # (D, 3D)   fused [Wq*scale | Wk | Wv]
O_WO = O_QKV + D               # (D, D)    out_proj weight (rows = concatenated heads)
O_WF1 = O_WO + D               # (D, FF)   linear1 weight
O_WF2 = O_WF1 + D              # (FF, D)   linear2 weight
O_VEC = O_WF2 + FF             # 8 rows: [0]=b_qkv [1]=out_proj.b [2]=ln1.w [3]=ln1.b
                               #         [4]=linear1.b [5]=linear2.b [6]=ln2.w [7]=ln2.b
LYR_ROWS = O_VEC + 8
MS_ROWS = R_LYR + NLAYERS * LYR_ROWS

assert NH == 2 and 3 * D <= 128 and TTYPE <= OUT_PAD and HD * NH == D
assert all(v % 8 == 0 for v in (IN_DIM, D, HID, FF, BS, R_WIN, R_WCL, R_WEFF, R_MISC,
                                R_SEG, R_AMASK, R_LYR, O_QKV, O_WO, O_WF1, O_WF2,
                                O_VEC, LYR_ROWS, MS_ROWS))


# ----------------------------------- kernel ------------------------------------
def classifier_kernel(x_ref, m_ref, ms_ref, out_ref):
    f32 = jnp.float32

    def mm(a, b):
        return jnp.dot(a, b, preferred_element_type=f32)

    def mm_nt(a, b):  # contract last dims of both operands (attention scores)
        return jnp.einsum('qd,kd->qk', a, b, preferred_element_type=f32)

    def layer_norm(v, w, b):
        mu = jnp.mean(v, axis=-1, keepdims=True)
        var = jnp.mean((v - mu) * (v - mu), axis=-1, keepdims=True)
        return (v - mu) * jax.lax.rsqrt(var + 1e-5) * w + b

    def softmax_last(v):
        v = v - jnp.max(v, axis=-1, keepdims=True)
        e = jnp.exp(v)
        return e * pl.reciprocal(jnp.sum(e, axis=-1, keepdims=True), approx=True)

    # ---- shared small views (static, 8-aligned row slices; lane slices on values) ----
    misc = ms_ref[R_MISC:R_MISC + 8, :]                       # (8, 128) fused biases
    seg = ms_ref[R_SEG:R_SEG + BS, :][:, :BS]                 # (BS, BS) same-batch 0/1
    amask = ms_ref[R_AMASK:R_AMASK + BS, :][:, :BS]           # (BS, BS) 0 / -1e30 (host-made)

    # ---- translate_titleemb + translate_APIemb (fused matmul, fused bias) ----
    x = (mm(x_ref[...], ms_ref[R_WIN:R_WIN + IN_DIM, :]) + misc[0:1, :])[:, :D]   # (BS, D)

    # ---- 2-layer post-norm TransformerEncoder (nhead=2, relu FFN, dropout = identity) ----
    for l in range(NLAYERS):
        r = R_LYR + LYR_ROWS * l
        w_qkv = ms_ref[r + O_QKV:r + O_QKV + D, :]            # (D, 128): lanes 0:3D used
        w_o = ms_ref[r + O_WO:r + O_WO + D, :]                # (D, 128): lanes 0:D used
        w_f1 = ms_ref[r + O_WF1:r + O_WF1 + D, :]             # (D, 128): lanes 0:FF used
        w_f2 = ms_ref[r + O_WF2:r + O_WF2 + FF, :]            # (FF,128): lanes 0:D used
        vec = ms_ref[r + O_VEC:r + O_VEC + 8, :]              # (8, 128) per-layer vectors

        # one fused QKV matmul for both heads (q columns pre-scaled by 1/sqrt(HD));
        # heads recovered with static lane slices, batch separation via additive mask.
        qkv = mm(x, w_qkv) + vec[0:1, :]                      # (BS, 128)
        heads = []
        for h in range(NH):
            q = qkv[:, h * HD:(h + 1) * HD]                   # (BS, HD)
            k = qkv[:, D + h * HD:D + (h + 1) * HD]
            v = qkv[:, 2 * D + h * HD:2 * D + (h + 1) * HD]
            p = softmax_last(mm_nt(q, k) + amask)             # (BS, BS)
            heads.append(mm(p, v))                            # (BS, HD)
        oc = jnp.concatenate(heads, axis=-1)                  # (BS, D) = MHA head concat
        attn = (mm(oc, w_o) + vec[1:2, :])[:, :D]             # single fused out_proj

        x = layer_norm(x + attn, vec[2:3, :D], vec[3:4, :D])
        ff = jnp.maximum(mm(x, w_f1) + vec[4:5, :], 0.0)[:, :FF]   # padded lanes are exactly 0
        ff = (mm(ff, w_f2) + vec[5:6, :])[:, :D]
        x = layer_norm(x + ff, vec[6:7, :D], vec[7:8, :D])

    # ---- linear_class ----
    xc = (mm(x, ms_ref[R_WCL:R_WCL + D, :]) + misc[1:2, :])[:, :HID]    # (BS, HID)

    # ---- Classifier.attention: masked pooling weights (per token, per channel; no seq reduce) ----
    aw = softmax_last(xc)                                     # softmax over the HID features
    maw = aw * m_ref[...]                                     # (BS, HID) * (BS, 1)
    denom = mm(seg, maw)                                      # per-batch sum over seq, broadcast
    maw = maw * pl.reciprocal(denom + 1e-8, approx=True)
    att = xc * maw

    # ---- logits_layer_cla (3 linears pre-fused on host), lane-dense (BS, 128) store ----
    out_ref[...] = mm(att, ms_ref[R_WEFF:R_WEFF + HID, :]) + misc[2:3, :]


# ------------------------- host-side parameter packing -------------------------
def pack_params(params):
    """Pure host-side layout work: exact weight algebra + zero padding (no compute moved)."""
    (w_tt, b_tt, w_api, b_api,
     ipw, ipb, opw, opb, ln1w, ln1b, f1w, f1b, f2w, f2b, ln2w, ln2b,
     wcl, bcl, wa, ba, wb, bb, wc, bc) = params
    f32 = jnp.float32
    scale = 1.0 / (HD ** 0.5)

    def put(slab, r, c, block):
        block = jnp.asarray(block, f32)
        return slab.at[r:r + block.shape[0], c:c + block.shape[1]].set(block)

    ms = jnp.zeros((MS_ROWS, 128), f32)

    # fused input projection, linear_class, exact 3-linear logits fusion
    ms = put(ms, R_WIN, 0, jnp.concatenate([w_tt, w_api], axis=0))       # (IN_DIM, D)
    ms = put(ms, R_WCL, 0, wcl)                                          # (D, HID)
    w_eff = wa @ wb @ wc                                                 # exact: no activations
    b_eff = ba @ wb @ wc + bb @ wc + bc
    ms = put(ms, R_WEFF, 0, w_eff)                                       # (HID, TTYPE)
    ms = put(ms, R_MISC + 0, 0, b_tt + b_api)                            # fused input bias
    ms = put(ms, R_MISC + 1, 0, bcl)
    ms = put(ms, R_MISC + 2, 0, b_eff)

    # same-batch 0/1 indicator (pooling) + precomputed additive attention mask
    bid = jnp.arange(BS) // S
    seg = (bid[:, None] == bid[None, :]).astype(f32)
    ms = put(ms, R_SEG, 0, seg)
    ms = put(ms, R_AMASK, 0, (seg - 1.0) * 1e30)                         # 0 within, -1e30 across

    # per-layer lane-dense weight blocks; 1/sqrt(HD) folded into the q columns
    col_scale = jnp.concatenate([jnp.full((D,), scale, f32), jnp.ones((2 * D,), f32)])
    for l in range(NLAYERS):
        r = R_LYR + LYR_ROWS * l
        ms = put(ms, r + O_QKV, 0, ipw[l] * col_scale[None, :])          # (D, 3D)
        ms = put(ms, r + O_WO, 0, opw[l])                                # (D, D)
        ms = put(ms, r + O_WF1, 0, f1w[l])                               # (D, FF)
        ms = put(ms, r + O_WF2, 0, f2w[l])                               # (FF, D)
        v = r + O_VEC
        ms = put(ms, v + 0, 0, ipb[l] * col_scale[None, :])              # fused qkv bias
        ms = put(ms, v + 1, 0, opb[l])
        ms = put(ms, v + 2, 0, ln1w[l])
        ms = put(ms, v + 3, 0, ln1b[l])
        ms = put(ms, v + 4, 0, f1b[l])      # padded lanes stay 0 (keeps FFN padding exact)
        ms = put(ms, v + 5, 0, f2b[l])
        ms = put(ms, v + 6, 0, ln2w[l])
        ms = put(ms, v + 7, 0, ln2b[l])
    return ms


# ---------------------------------- wrapper ------------------------------------
def classifier_forward(title_emb, api_emb, masks, params):
    ms = pack_params(params)

    x_in = jnp.concatenate(
        [title_emb.reshape(BS, TITLE_EMB), api_emb.reshape(BS, API_DIM)],
        axis=-1).astype(jnp.float32)                          # (BS, IN_DIM)
    mask_in = masks.reshape(BS, 1).astype(jnp.float32)

    # Single-shot kernel: no grid -> whole arrays are placed in VMEM, no double
    # buffering / pipeline prologue for a 1-step invocation.
    # TODO(synk): for production batch sizes, add a "parallel" grid axis over row
    # blocks (BS >= 256) to use both v7x TensorCores and amortize per-call overhead.
    out = pl.pallas_call(
        classifier_kernel,
        out_shape=jax.ShapeDtypeStruct((BS, OUT_PAD), jnp.float32),
    )(x_in, mask_in, ms)

    return out.reshape(B, S, OUT_PAD)[:, :, :TTYPE]


# ------------------------------ parameter init ---------------------------------
def init_params(key):
    keys = iter(jax.random.split(key, 32))

    def lin(shape, scale=0.02):
        return jax.random.normal(next(keys), shape, jnp.float32) * scale

    return [
        # translate_titleemb / translate_APIemb
        lin((TITLE_EMB, D)), lin((1, D)),
        lin((API_DIM, D)), lin((1, D)),
        # transformer layers (stacked over NLAYERS), weights stored (in, out)
        lin((NLAYERS, D, 3 * D)), lin((NLAYERS, 1, 3 * D)),      # in_proj (q|k|v columns)
        lin((NLAYERS, D, D)), lin((NLAYERS, 1, D)),              # out_proj
        jnp.ones((NLAYERS, 1, D), jnp.float32),                  # norm1 w
        jnp.zeros((NLAYERS, 1, D), jnp.float32),                 # norm1 b
        lin((NLAYERS, D, FF)), lin((NLAYERS, 1, FF)),            # linear1
        lin((NLAYERS, FF, D)), lin((NLAYERS, 1, D)),             # linear2
        jnp.ones((NLAYERS, 1, D), jnp.float32),                  # norm2 w
        jnp.zeros((NLAYERS, 1, D), jnp.float32),                 # norm2 b
        # linear_class
        lin((D, HID)), lin((1, HID)),
        # logits_layer_cla: Linear(H,2H), Linear(2H,H), Linear(H,ttype)
        lin((HID, D)), lin((1, D)),
        lin((D, HID)), lin((1, HID)),
        lin((HID, TTYPE)), lin((1, TTYPE)),
    ]


if __name__ == "__main__":
    key = jax.random.PRNGKey(0)
    kp, ke, ki, ka, km = jax.random.split(key, 5)
    params = init_params(kp)

    # title_encoder is an external embedding module: model it as a table lookup
    # on the host (glue), feeding the kernel the embedded titles.
    emb_table = jax.random.normal(ke, (VOCAB, TITLE_EMB), jnp.float32) * 0.02
    title_ids = jax.random.randint(ki, (B, S), 0, VOCAB)
    title_emb = emb_table[title_ids]                           # (B, S, TITLE_EMB)

    api_emb = jax.random.normal(ka, (B, S, API_DIM), jnp.float32) * 0.02
    masks = (jax.random.uniform(km, (B, S)) > 0.3).astype(jnp.float32)

    out = classifier_forward(title_emb, api_emb, masks, params)
    out = jax.block_until_ready(out)
    assert out.shape == (B, S, TTYPE) and out.dtype == jnp.float32
    assert bool(jnp.all(jnp.isfinite(out)))
    print("KERNEL_OK")
</pallas_src>

<mosaic_0001>
module attributes {stable_mosaic.version = 11 : i64} {
  func.func @classifier_kernel(%arg0: memref<16x232xf32, #tpu.memory_space<vmem>>, %arg1: memref<16x1xf32, #tpu.memory_space<vmem>>, %arg2: memref<560x128xf32, #tpu.memory_space<vmem>>, %arg3: memref<16x128xf32, #tpu.memory_space<vmem>>) attributes {dimension_semantics = [], scalar_prefetch = 0 : i64, scratch_operands = 0 : i64, tpu.core_type = #tpu.core_type<tc>} {
    %c280 = arith.constant 280 : index
    %c0 = arith.constant 0 : index
    %0 = vector.load %arg2[%c280, %c0] : memref<560x128xf32, #tpu.memory_space<vmem>>, vector<8x128xf32>
    %c288 = arith.constant 288 : index
    %c0_0 = arith.constant 0 : index
    %1 = vector.load %arg2[%c288, %c0_0] : memref<560x128xf32, #tpu.memory_space<vmem>>, vector<16x128xf32>
    %2 = vector.extract_strided_slice %1 {offsets = [0, 0], sizes = [16, 16], strides = [1, 1]} : vector<16x128xf32> to vector<16x16xf32>
    %c304 = arith.constant 304 : index
    %c0_1 = arith.constant 0 : index
    %3 = vector.load %arg2[%c304, %c0_1] : memref<560x128xf32, #tpu.memory_space<vmem>>, vector<16x128xf32>
    %4 = vector.extract_strided_slice %3 {offsets = [0, 0], sizes = [16, 16], strides = [1, 1]} : vector<16x128xf32> to vector<16x16xf32>
    %c0_2 = arith.constant 0 : index
    %c0_3 = arith.constant 0 : index
    %5 = vector.load %arg0[%c0_2, %c0_3] : memref<16x232xf32, #tpu.memory_space<vmem>>, vector<16x232xf32>
    %c0_4 = arith.constant 0 : index
    %c0_5 = arith.constant 0 : index
    %6 = vector.load %arg2[%c0_4, %c0_5] : memref<560x128xf32, #tpu.memory_space<vmem>>, vector<232x128xf32>
    %cst = arith.constant dense<0.000000e+00> : vector<16x128xf32>
    %7 = tpu.matmul %5, %6, %cst {dimension_numbers = #tpu.dot_dimension_numbers<[1], [0], [0], [1], [0, 0, 1, 1], [], []>} : vector<16x232xf32>, vector<232x128xf32>, vector<16x128xf32> -> vector<16x128xf32>
    %8 = vector.extract_strided_slice %0 {offsets = [0, 0], sizes = [1, 128], strides = [1, 1]} : vector<8x128xf32> to vector<1x128xf32>
    %9 = vector.broadcast %8 : vector<1x128xf32> to vector<16x128xf32>
    %10 = arith.addf %7, %9 : vector<16x128xf32>
    %11 = vector.extract_strided_slice %10 {offsets = [0, 0], sizes = [16, 32], strides = [1, 1]} : vector<16x128xf32> to vector<16x32xf32>
    %c320 = arith.constant 320 : index
    %c0_6 = arith.constant 0 : index
    %12 = vector.load %arg2[%c320, %c0_6] : memref<560x128xf32, #tpu.memory_space<vmem>>, vector<32x128xf32>
    %c352 = arith.constant 352 : index
    %c0_7 = arith.constant 0 : index
    %13 = vector.load %arg2[%c352, %c0_7] : memref<560x128xf32, #tpu.memory_space<vmem>>, vector<32x128xf32>
    %c384 = arith.constant 384 : index
    %c0_8 = arith.constant 0 : index
    %14 = vector.load %arg2[%c384, %c0_8] : memref<560x128xf32, #tpu.memory_space<vmem>>, vector<32x128xf32>
    %c416 = arith.constant 416 : index
    %c0_9 = arith.constant 0 : index
    %15 = vector.load %arg2[%c416, %c0_9] : memref<560x128xf32, #tpu.memory_space<vmem>>, vector<16x128xf32>
    %c432 = arith.constant 432 : index
    %c0_10 = arith.constant 0 : index
    %16 = vector.load %arg2[%c432, %c0_10] : memref<560x128xf32, #tpu.memory_space<vmem>>, vector<8x128xf32>
    %cst_11 = arith.constant dense<0.000000e+00> : vector<16x128xf32>
    %17 = tpu.matmul %11, %12, %cst_11 {dimension_numbers = #tpu.dot_dimension_numbers<[1], [0], [0], [1], [0, 0, 1, 1], [], []>} : vector<16x32xf32>, vector<32x128xf32>, vector<16x128xf32> -> vector<16x128xf32>
    %18 = vector.extract_strided_slice %16 {offsets = [0, 0], sizes = [1, 128], strides = [1, 1]} : vector<8x128xf32> to vector<1x128xf32>
    %19 = vector.broadcast %18 : vector<1x128xf32> to vector<16x128xf32>
    %20 = arith.addf %17, %19 : vector<16x128xf32>
    %21 = vector.extract_strided_slice %20 {offsets = [0, 0], sizes = [16, 16], strides = [1, 1]} : vector<16x128xf32> to vector<16x16xf32>
    %22 = vector.extract_strided_slice %20 {offsets = [0, 32], sizes = [16, 16], strides = [1, 1]} : vector<16x128xf32> to vector<16x16xf32>
    %23 = vector.extract_strided_slice %20 {offsets = [0, 64], sizes = [16, 16], strides = [1, 1]} : vector<16x128xf32> to vector<16x16xf32>
    "tpu.trace_start"() <{level = 10 : i32, message = "qd,kd->qk"}> : () -> ()
    %cst_12 = arith.constant dense<0.000000e+00> : vector<16x16xf32>
    %24 = tpu.matmul %21, %22, %cst_12 {dimension_numbers = #tpu.dot_dimension_numbers<[1], [1], [0], [0], [0, 0, 1, 0], [], []>} : vector<16x16xf32>, vector<16x16xf32>, vector<16x16xf32> -> vector<16x16xf32>
    "tpu.trace_stop"() : () -> ()
    %25 = arith.addf %24, %4 : vector<16x16xf32>
    %cst_13 = arith.constant dense<0xFF800000> : vector<16xf32>
    %26 = vector.multi_reduction <maximumf>, %25, %cst_13 [1] : vector<16x16xf32> to vector<16xf32>
    %27 = vector.shape_cast %26 : vector<16xf32> to vector<16x1xf32>
    %28 = vector.broadcast %27 : vector<16x1xf32> to vector<16x16xf32>
    %29 = arith.subf %25, %28 : vector<16x16xf32>
    %30 = math.exp %29 : vector<16x16xf32>
    %cst_14 = arith.constant dense<0.000000e+00> : vector<16xf32>
    %31 = vector.multi_reduction <add>, %30, %cst_14 [1] : vector<16x16xf32> to vector<16xf32>
    %32 = vector.shape_cast %31 : vector<16xf32> to vector<16x1xf32>
    %33 = tpu.reciprocal %32 {approx = true} : vector<16x1xf32> -> vector<16x1xf32>
    %34 = vector.broadcast %33 : vector<16x1xf32> to vector<16x16xf32>
    %35 = arith.mulf %30, %34 : vector<16x16xf32>
    %cst_15 = arith.constant dense<0.000000e+00> : vector<16x16xf32>
    %36 = tpu.matmul %35, %23, %cst_15 {dimension_numbers = #tpu.dot_dimension_numbers<[1], [0], [0], [1], [0, 0, 1, 1], [], []>} : vector<16x16xf32>, vector<16x16xf32>, vector<16x16xf32> -> vector<16x16xf32>
    %37 = vector.extract_strided_slice %20 {offsets = [0, 16], sizes = [16, 16], strides = [1, 1]} : vector<16x128xf32> to vector<16x16xf32>
    %38 = vector.extract_strided_slice %20 {offsets = [0, 48], sizes = [16, 16], strides = [1, 1]} : vector<16x128xf32> to vector<16x16xf32>
    %39 = vector.extract_strided_slice %20 {offsets = [0, 80], sizes = [16, 16], strides = [1, 1]} : vector<16x128xf32> to vector<16x16xf32>
    "tpu.trace_start"() <{level = 10 : i32, message = "qd,kd->qk"}> : () -> ()
    %cst_16 = arith.constant dense<0.000000e+00> : vector<16x16xf32>
    %40 = tpu.matmul %37, %38, %cst_16 {dimension_numbers = #tpu.dot_dimension_numbers<[1], [1], [0], [0], [0, 0, 1, 0], [], []>} : vector<16x16xf32>, vector<16x16xf32>, vector<16x16xf32> -> vector<16x16xf32>
    "tpu.trace_stop"() : () -> ()
    %41 = arith.addf %40, %4 : vector<16x16xf32>
    %cst_17 = arith.constant dense<0xFF800000> : vector<16xf32>
    %42 = vector.multi_reduction <maximumf>, %41, %cst_17 [1] : vector<16x16xf32> to vector<16xf32>
    %43 = vector.shape_cast %42 : vector<16xf32> to vector<16x1xf32>
    %44 = vector.broadcast %43 : vector<16x1xf32> to vector<16x16xf32>
    %45 = arith.subf %41, %44 : vector<16x16xf32>
    %46 = math.exp %45 : vector<16x16xf32>
    %cst_18 = arith.constant dense<0.000000e+00> : vector<16xf32>
    %47 = vector.multi_reduction <add>, %46, %cst_18 [1] : vector<16x16xf32> to vector<16xf32>
    %48 = vector.shape_cast %47 : vector<16xf32> to vector<16x1xf32>
    %49 = tpu.reciprocal %48 {approx = true} : vector<16x1xf32> -> vector<16x1xf32>
    %50 = vector.broadcast %49 : vector<16x1xf32> to vector<16x16xf32>
    %51 = arith.mulf %46, %50 : vector<16x16xf32>
    %cst_19 = arith.constant dense<0.000000e+00> : vector<16x16xf32>
    %52 = tpu.matmul %51, %39, %cst_19 {dimension_numbers = #tpu.dot_dimension_numbers<[1], [0], [0], [1], [0, 0, 1, 1], [], []>} : vector<16x16xf32>, vector<16x16xf32>, vector<16x16xf32> -> vector<16x16xf32>
    %53 = tpu.concatenate %36, %52 in 1 : vector<16x16xf32>, vector<16x16xf32> -> vector<16x32xf32>
    %cst_20 = arith.constant dense<0.000000e+00> : vector<16x128xf32>
    %54 = tpu.matmul %53, %13, %cst_20 {dimension_numbers = #tpu.dot_dimension_numbers<[1], [0], [0], [1], [0, 0, 1, 1], [], []>} : vector<16x32xf32>, vector<32x128xf32>, vector<16x128xf32> -> vector<16x128xf32>
    %55 = vector.extract_strided_slice %16 {offsets = [1, 0], sizes = [1, 128], strides = [1, 1]} : vector<8x128xf32> to vector<1x128xf32>
    %56 = vector.broadcast %55 : vector<1x128xf32> to vector<16x128xf32>
    %57 = arith.addf %54, %56 : vector<16x128xf32>
    %58 = vector.extract_strided_slice %57 {offsets = [0, 0], sizes = [16, 32], strides = [1, 1]} : vector<16x128xf32> to vector<16x32xf32>
    %59 = arith.addf %11, %58 : vector<16x32xf32>
    %60 = vector.extract_strided_slice %16 {offsets = [2, 0], sizes = [1, 32], strides = [1, 1]} : vector<8x128xf32> to vector<1x32xf32>
    %61 = vector.extract_strided_slice %16 {offsets = [3, 0], sizes = [1, 32], strides = [1, 1]} : vector<8x128xf32> to vector<1x32xf32>
    %cst_21 = arith.constant dense<0.000000e+00> : vector<16xf32>
    %62 = vector.multi_reduction <add>, %59, %cst_21 [1] : vector<16x32xf32> to vector<16xf32>
    %63 = vector.shape_cast %62 : vector<16xf32> to vector<16x1xf32>
    %cst_22 = arith.constant 3.200000e+01 : f32
    %64 = vector.broadcast %cst_22 : f32 to vector<16x1xf32>
    %65 = arith.divf %63, %64 : vector<16x1xf32>
    %66 = vector.broadcast %65 : vector<16x1xf32> to vector<16x32xf32>
    %67 = arith.subf %59, %66 : vector<16x32xf32>
    %68 = vector.broadcast %65 : vector<16x1xf32> to vector<16x32xf32>
    %69 = arith.subf %59, %68 : vector<16x32xf32>
    %70 = arith.mulf %67, %69 : vector<16x32xf32>
    %cst_23 = arith.constant dense<0.000000e+00> : vector<16xf32>
    %71 = vector.multi_reduction <add>, %70, %cst_23 [1] : vector<16x32xf32> to vector<16xf32>
    %72 = vector.shape_cast %71 : vector<16xf32> to vector<16x1xf32>
    %cst_24 = arith.constant 3.200000e+01 : f32
    %73 = vector.broadcast %cst_24 : f32 to vector<16x1xf32>
    %74 = arith.divf %72, %73 : vector<16x1xf32>
    %75 = vector.broadcast %65 : vector<16x1xf32> to vector<16x32xf32>
    %76 = arith.subf %59, %75 : vector<16x32xf32>
    %cst_25 = arith.constant 9.99999974E-6 : f32
    %77 = vector.broadcast %cst_25 : f32 to vector<16x1xf32>
    %78 = arith.addf %74, %77 : vector<16x1xf32>
    %79 = math.rsqrt %78 : vector<16x1xf32>
    %80 = vector.broadcast %79 : vector<16x1xf32> to vector<16x32xf32>
    %81 = arith.mulf %76, %80 : vector<16x32xf32>
    %82 = vector.broadcast %60 : vector<1x32xf32> to vector<16x32xf32>
    %83 = arith.mulf %81, %82 : vector<16x32xf32>
    %84 = vector.broadcast %61 : vector<1x32xf32> to vector<16x32xf32>
    %85 = arith.addf %83, %84 : vector<16x32xf32>
    %cst_26 = arith.constant dense<0.000000e+00> : vector<16x128xf32>
    %86 = tpu.matmul %85, %14, %cst_26 {dimension_numbers = #tpu.dot_dimension_numbers<[1], [0], [0], [1], [0, 0, 1, 1], [], []>} : vector<16x32xf32>, vector<32x128xf32>, vector<16x128xf32> -> vector<16x128xf32>
    %87 = vector.extract_strided_slice %16 {offsets = [4, 0], sizes = [1, 128], strides = [1, 1]} : vector<8x128xf32> to vector<1x128xf32>
    %88 = vector.broadcast %87 : vector<1x128xf32> to vector<16x128xf32>
    %89 = arith.addf %86, %88 : vector<16x128xf32>
    %cst_27 = arith.constant 0.000000e+00 : f32
    %90 = vector.broadcast %cst_27 : f32 to vector<16x128xf32>
    %91 = arith.maximumf %89, %90 : vector<16x128xf32>
    %92 = vector.extract_strided_slice %91 {offsets = [0, 0], sizes = [16, 16], strides = [1, 1]} : vector<16x128xf32> to vector<16x16xf32>
    %cst_28 = arith.constant dense<0.000000e+00> : vector<16x128xf32>
    %93 = tpu.matmul %92, %15, %cst_28 {dimension_numbers = #tpu.dot_dimension_numbers<[1], [0], [0], [1], [0, 0, 1, 1], [], []>} : vector<16x16xf32>, vector<16x128xf32>, vector<16x128xf32> -> vector<16x128xf32>
    %94 = vector.extract_strided_slice %16 {offsets = [5, 0], sizes = [1, 128], strides = [1, 1]} : vector<8x128xf32> to vector<1x128xf32>
    %95 = vector.broadcast %94 : vector<1x128xf32> to vector<16x128xf32>
    %96 = arith.addf %93, %95 : vector<16x128xf32>
    %97 = vector.extract_strided_slice %96 {offsets = [0, 0], sizes = [16, 32], strides = [1, 1]} : vector<16x128xf32> to vector<16x32xf32>
    %98 = arith.addf %85, %97 : vector<16x32xf32>
    %99 = vector.extract_strided_slice %16 {offsets = [6, 0], sizes = [1, 32], strides = [1, 1]} : vector<8x128xf32> to vector<1x32xf32>
    %100 = vector.extract_strided_slice %16 {offsets = [7, 0], sizes = [1, 32], strides = [1, 1]} : vector<8x128xf32> to vector<1x32xf32>
    %cst_29 = arith.constant dense<0.000000e+00> : vector<16xf32>
    %101 = vector.multi_reduction <add>, %98, %cst_29 [1] : vector<16x32xf32> to vector<16xf32>
    %102 = vector.shape_cast %101 : vector<16xf32> to vector<16x1xf32>
    %cst_30 = arith.constant 3.200000e+01 : f32
    %103 = vector.broadcast %cst_30 : f32 to vector<16x1xf32>
    %104 = arith.divf %102, %103 : vector<16x1xf32>
    %105 = vector.broadcast %104 : vector<16x1xf32> to vector<16x32xf32>
    %106 = arith.subf %98, %105 : vector<16x32xf32>
    %107 = vector.broadcast %104 : vector<16x1xf32> to vector<16x32xf32>
    %108 = arith.subf %98, %107 : vector<16x32xf32>
    %109 = arith.mulf %106, %108 : vector<16x32xf32>
    %cst_31 = arith.constant dense<0.000000e+00> : vector<16xf32>
    %110 = vector.multi_reduction <add>, %109, %cst_31 [1] : vector<16x32xf32> to vector<16xf32>
    %111 = vector.shape_cast %110 : vector<16xf32> to vector<16x1xf32>
    %cst_32 = arith.constant 3.200000e+01 : f32
    %112 = vector.broadcast %cst_32 : f32 to vector<16x1xf32>
    %113 = arith.divf %111, %112 : vector<16x1xf32>
    %114 = vector.broadcast %104 : vector<16x1xf32> to vector<16x32xf32>
    %115 = arith.subf %98, %114 : vector<16x32xf32>
    %cst_33 = arith.constant 9.99999974E-6 : f32
    %116 = vector.broadcast %cst_33 : f32 to vector<16x1xf32>
    %117 = arith.addf %113, %116 : vector<16x1xf32>
    %118 = math.rsqrt %117 : vector<16x1xf32>
    %119 = vector.broadcast %118 : vector<16x1xf32> to vector<16x32xf32>
    %120 = arith.mulf %115, %119 : vector<16x32xf32>
    %121 = vector.broadcast %99 : vector<1x32xf32> to vector<16x32xf32>
    %122 = arith.mulf %120, %121 : vector<16x32xf32>
    %123 = vector.broadcast %100 : vector<1x32xf32> to vector<16x32xf32>
    %124 = arith.addf %122, %123 : vector<16x32xf32>
    %c440 = arith.constant 440 : index
    %c0_34 = arith.constant 0 : index
    %125 = vector.load %arg2[%c440, %c0_34] : memref<560x128xf32, #tpu.memory_space<vmem>>, vector<32x128xf32>
    %c472 = arith.constant 472 : index
    %c0_35 = arith.constant 0 : index
    %126 = vector.load %arg2[%c472, %c0_35] : memref<560x128xf32, #tpu.memory_space<vmem>>, vector<32x128xf32>
    %c504 = arith.constant 504 : index
    %c0_36 = arith.constant 0 : index
    %127 = vector.load %arg2[%c504, %c0_36] : memref<560x128xf32, #tpu.memory_space<vmem>>, vector<32x128xf32>
    %c536 = arith.constant 536 : index
    %c0_37 = arith.constant 0 : index
    %128 = vector.load %arg2[%c536, %c0_37] : memref<560x128xf32, #tpu.memory_space<vmem>>, vector<16x128xf32>
    %c552 = arith.constant 552 : index
    %c0_38 = arith.constant 0 : index
    %129 = vector.load %arg2[%c552, %c0_38] : memref<560x128xf32, #tpu.memory_space<vmem>>, vector<8x128xf32>
    %cst_39 = arith.constant dense<0.000000e+00> : vector<16x128xf32>
    %130 = tpu.matmul %124, %125, %cst_39 {dimension_numbers = #tpu.dot_dimension_numbers<[1], [0], [0], [1], [0, 0, 1, 1], [], []>} : vector<16x32xf32>, vector<32x128xf32>, vector<16x128xf32> -> vector<16x128xf32>
    %131 = vector.extract_strided_slice %129 {offsets = [0, 0], sizes = [1, 128], strides = [1, 1]} : vector<8x128xf32> to vector<1x128xf32>
    %132 = vector.broadcast %131 : vector<1x128xf32> to vector<16x128xf32>
    %133 = arith.addf %130, %132 : vector<16x128xf32>
    %134 = vector.extract_strided_slice %133 {offsets = [0, 0], sizes = [16, 16], strides = [1, 1]} : vector<16x128xf32> to vector<16x16xf32>
    %135 = vector.extract_strided_slice %133 {offsets = [0, 32], sizes = [16, 16], strides = [1, 1]} : vector<16x128xf32> to vector<16x16xf32>
    %136 = vector.extract_strided_slice %133 {offsets = [0, 64], sizes = [16, 16], strides = [1, 1]} : vector<16x128xf32> to vector<16x16xf32>
    "tpu.trace_start"() <{level = 10 : i32, message = "qd,kd->qk"}> : () -> ()
    %cst_40 = arith.constant dense<0.000000e+00> : vector<16x16xf32>
    %137 = tpu.matmul %134, %135, %cst_40 {dimension_numbers = #tpu.dot_dimension_numbers<[1], [1], [0], [0], [0, 0, 1, 0], [], []>} : vector<16x16xf32>, vector<16x16xf32>, vector<16x16xf32> -> vector<16x16xf32>
    "tpu.trace_stop"() : () -> ()
    %138 = arith.addf %137, %4 : vector<16x16xf32>
    %cst_41 = arith.constant dense<0xFF800000> : vector<16xf32>
    %139 = vector.multi_reduction <maximumf>, %138, %cst_41 [1] : vector<16x16xf32> to vector<16xf32>
    %140 = vector.shape_cast %139 : vector<16xf32> to vector<16x1xf32>
    %141 = vector.broadcast %140 : vector<16x1xf32> to vector<16x16xf32>
    %142 = arith.subf %138, %141 : vector<16x16xf32>
    %143 = math.exp %142 : vector<16x16xf32>
    %cst_42 = arith.constant dense<0.000000e+00> : vector<16xf32>
    %144 = vector.multi_reduction <add>, %143, %cst_42 [1] : vector<16x16xf32> to vector<16xf32>
    %145 = vector.shape_cast %144 : vector<16xf32> to vector<16x1xf32>
    %146 = tpu.reciprocal %145 {approx = true} : vector<16x1xf32> -> vector<16x1xf32>
    %147 = vector.broadcast %146 : vector<16x1xf32> to vector<16x16xf32>
    %148 = arith.mulf %143, %147 : vector<16x16xf32>
    %cst_43 = arith.constant dense<0.000000e+00> : vector<16x16xf32>
    %149 = tpu.matmul %148, %136, %cst_43 {dimension_numbers = #tpu.dot_dimension_numbers<[1], [0], [0], [1], [0, 0, 1, 1], [], []>} : vector<16x16xf32>, vector<16x16xf32>, vector<16x16xf32> -> vector<16x16xf32>
    %150 = vector.extract_strided_slice %133 {offsets = [0, 16], sizes = [16, 16], strides = [1, 1]} : vector<16x128xf32> to vector<16x16xf32>
    %151 = vector.extract_strided_slice %133 {offsets = [0, 48], sizes = [16, 16], strides = [1, 1]} : vector<16x128xf32> to vector<16x16xf32>
    %152 = vector.extract_strided_slice %133 {offsets = [0, 80], sizes = [16, 16], strides = [1, 1]} : vector<16x128xf32> to vector<16x16xf32>
    "tpu.trace_start"() <{level = 10 : i32, message = "qd,kd->qk"}> : () -> ()
    %cst_44 = arith.constant dense<0.000000e+00> : vector<16x16xf32>
    %153 = tpu.matmul %150, %151, %cst_44 {dimension_numbers = #tpu.dot_dimension_numbers<[1], [1], [0], [0], [0, 0, 1, 0], [], []>} : vector<16x16xf32>, vector<16x16xf32>, vector<16x16xf32> -> vector<16x16xf32>
    "tpu.trace_stop"() : () -> ()
    %154 = arith.addf %153, %4 : vector<16x16xf32>
    %cst_45 = arith.constant dense<0xFF800000> : vector<16xf32>
    %155 = vector.multi_reduction <maximumf>, %154, %cst_45 [1] : vector<16x16xf32> to vector<16xf32>
    %156 = vector.shape_cast %155 : vector<16xf32> to vector<16x1xf32>
    %157 = vector.broadcast %156 : vector<16x1xf32> to vector<16x16xf32>
    %158 = arith.subf %154, %157 : vector<16x16xf32>
    %159 = math.exp %158 : vector<16x16xf32>
    %cst_46 = arith.constant dense<0.000000e+00> : vector<16xf32>
    %160 = vector.multi_reduction <add>, %159, %cst_46 [1] : vector<16x16xf32> to vector<16xf32>
    %161 = vector.shape_cast %160 : vector<16xf32> to vector<16x1xf32>
    %162 = tpu.reciprocal %161 {approx = true} : vector<16x1xf32> -> vector<16x1xf32>
    %163 = vector.broadcast %162 : vector<16x1xf32> to vector<16x16xf32>
    %164 = arith.mulf %159, %163 : vector<16x16xf32>
    %cst_47 = arith.constant dense<0.000000e+00> : vector<16x16xf32>
    %165 = tpu.matmul %164, %152, %cst_47 {dimension_numbers = #tpu.dot_dimension_numbers<[1], [0], [0], [1], [0, 0, 1, 1], [], []>} : vector<16x16xf32>, vector<16x16xf32>, vector<16x16xf32> -> vector<16x16xf32>
    %166 = tpu.concatenate %149, %165 in 1 : vector<16x16xf32>, vector<16x16xf32> -> vector<16x32xf32>
    %cst_48 = arith.constant dense<0.000000e+00> : vector<16x128xf32>
    %167 = tpu.matmul %166, %126, %cst_48 {dimension_numbers = #tpu.dot_dimension_numbers<[1], [0], [0], [1], [0, 0, 1, 1], [], []>} : vector<16x32xf32>, vector<32x128xf32>, vector<16x128xf32> -> vector<16x128xf32>
    %168 = vector.extract_strided_slice %129 {offsets = [1, 0], sizes = [1, 128], strides = [1, 1]} : vector<8x128xf32> to vector<1x128xf32>
    %169 = vector.broadcast %168 : vector<1x128xf32> to vector<16x128xf32>
    %170 = arith.addf %167, %169 : vector<16x128xf32>
    %171 = vector.extract_strided_slice %170 {offsets = [0, 0], sizes = [16, 32], strides = [1, 1]} : vector<16x128xf32> to vector<16x32xf32>
    %172 = arith.addf %124, %171 : vector<16x32xf32>
    %173 = vector.extract_strided_slice %129 {offsets = [2, 0], sizes = [1, 32], strides = [1, 1]} : vector<8x128xf32> to vector<1x32xf32>
    %174 = vector.extract_strided_slice %129 {offsets = [3, 0], sizes = [1, 32], strides = [1, 1]} : vector<8x128xf32> to vector<1x32xf32>
    %cst_49 = arith.constant dense<0.000000e+00> : vector<16xf32>
    %175 = vector.multi_reduction <add>, %172, %cst_49 [1] : vector<16x32xf32> to vector<16xf32>
    %176 = vector.shape_cast %175 : vector<16xf32> to vector<16x1xf32>
    %cst_50 = arith.constant 3.200000e+01 : f32
    %177 = vector.broadcast %cst_50 : f32 to vector<16x1xf32>
    %178 = arith.divf %176, %177 : vector<16x1xf32>
    %179 = vector.broadcast %178 : vector<16x1xf32> to vector<16x32xf32>
    %180 = arith.subf %172, %179 : vector<16x32xf32>
    %181 = vector.broadcast %178 : vector<16x1xf32> to vector<16x32xf32>
    %182 = arith.subf %172, %181 : vector<16x32xf32>
    %183 = arith.mulf %180, %182 : vector<16x32xf32>
    %cst_51 = arith.constant dense<0.000000e+00> : vector<16xf32>
    %184 = vector.multi_reduction <add>, %183, %cst_51 [1] : vector<16x32xf32> to vector<16xf32>
    %185 = vector.shape_cast %184 : vector<16xf32> to vector<16x1xf32>
    %cst_52 = arith.constant 3.200000e+01 : f32
    %186 = vector.broadcast %cst_52 : f32 to vector<16x1xf32>
    %187 = arith.divf %185, %186 : vector<16x1xf32>
    %188 = vector.broadcast %178 : vector<16x1xf32> to vector<16x32xf32>
    %189 = arith.subf %172, %188 : vector<16x32xf32>
    %cst_53 = arith.constant 9.99999974E-6 : f32
    %190 = vector.broadcast %cst_53 : f32 to vector<16x1xf32>
    %191 = arith.addf %187, %190 : vector<16x1xf32>
    %192 = math.rsqrt %191 : vector<16x1xf32>
    %193 = vector.broadcast %192 : vector<16x1xf32> to vector<16x32xf32>
    %194 = arith.mulf %189, %193 : vector<16x32xf32>
    %195 = vector.broadcast %173 : vector<1x32xf32> to vector<16x32xf32>
    %196 = arith.mulf %194, %195 : vector<16x32xf32>
    %197 = vector.broadcast %174 : vector<1x32xf32> to vector<16x32xf32>
    %198 = arith.addf %196, %197 : vector<16x32xf32>
    %cst_54 = arith.constant dense<0.000000e+00> : vector<16x128xf32>
    %199 = tpu.matmul %198, %127, %cst_54 {dimension_numbers = #tpu.dot_dimension_numbers<[1], [0], [0], [1], [0, 0, 1, 1], [], []>} : vector<16x32xf32>, vector<32x128xf32>, vector<16x128xf32> -> vector<16x128xf32>
    %200 = vector.extract_strided_slice %129 {offsets = [4, 0], sizes = [1, 128], strides = [1, 1]} : vector<8x128xf32> to vector<1x128xf32>
    %201 = vector.broadcast %200 : vector<1x128xf32> to vector<16x128xf32>
    %202 = arith.addf %199, %201 : vector<16x128xf32>
    %cst_55 = arith.constant 0.000000e+00 : f32
    %203 = vector.broadcast %cst_55 : f32 to vector<16x128xf32>
    %204 = arith.maximumf %202, %203 : vector<16x128xf32>
    %205 = vector.extract_strided_slice %204 {offsets = [0, 0], sizes = [16, 16], strides = [1, 1]} : vector<16x128xf32> to vector<16x16xf32>
    %cst_56 = arith.constant dense<0.000000e+00> : vector<16x128xf32>
    %206 = tpu.matmul %205, %128, %cst_56 {dimension_numbers = #tpu.dot_dimension_numbers<[1], [0], [0], [1], [0, 0, 1, 1], [], []>} : vector<16x16xf32>, vector<16x128xf32>, vector<16x128xf32> -> vector<16x128xf32>
    %207 = vector.extract_strided_slice %129 {offsets = [5, 0], sizes = [1, 128], strides = [1, 1]} : vector<8x128xf32> to vector<1x128xf32>
    %208 = vector.broadcast %207 : vector<1x128xf32> to vector<16x128xf32>
    %209 = arith.addf %206, %208 : vector<16x128xf32>
    %210 = vector.extract_strided_slice %209 {offsets = [0, 0], sizes = [16, 32], strides = [1, 1]} : vector<16x128xf32> to vector<16x32xf32>
    %211 = arith.addf %198, %210 : vector<16x32xf32>
    %212 = vector.extract_strided_slice %129 {offsets = [6, 0], sizes = [1, 32], strides = [1, 1]} : vector<8x128xf32> to vector<1x32xf32>
    %213 = vector.extract_strided_slice %129 {offsets = [7, 0], sizes = [1, 32], strides = [1, 1]} : vector<8x128xf32> to vector<1x32xf32>
    %cst_57 = arith.constant dense<0.000000e+00> : vector<16xf32>
    %214 = vector.multi_reduction <add>, %211, %cst_57 [1] : vector<16x32xf32> to vector<16xf32>
    %215 = vector.shape_cast %214 : vector<16xf32> to vector<16x1xf32>
    %cst_58 = arith.constant 3.200000e+01 : f32
    %216 = vector.broadcast %cst_58 : f32 to vector<16x1xf32>
    %217 = arith.divf %215, %216 : vector<16x1xf32>
    %218 = vector.broadcast %217 : vector<16x1xf32> to vector<16x32xf32>
    %219 = arith.subf %211, %218 : vector<16x32xf32>
    %220 = vector.broadcast %217 : vector<16x1xf32> to vector<16x32xf32>
    %221 = arith.subf %211, %220 : vector<16x32xf32>
    %222 = arith.mulf %219, %221 : vector<16x32xf32>
    %cst_59 = arith.constant dense<0.000000e+00> : vector<16xf32>
    %223 = vector.multi_reduction <add>, %222, %cst_59 [1] : vector<16x32xf32> to vector<16xf32>
    %224 = vector.shape_cast %223 : vector<16xf32> to vector<16x1xf32>
    %cst_60 = arith.constant 3.200000e+01 : f32
    %225 = vector.broadcast %cst_60 : f32 to vector<16x1xf32>
    %226 = arith.divf %224, %225 : vector<16x1xf32>
    %227 = vector.broadcast %217 : vector<16x1xf32> to vector<16x32xf32>
    %228 = arith.subf %211, %227 : vector<16x32xf32>
    %cst_61 = arith.constant 9.99999974E-6 : f32
    %229 = vector.broadcast %cst_61 : f32 to vector<16x1xf32>
    %230 = arith.addf %226, %229 : vector<16x1xf32>
    %231 = math.rsqrt %230 : vector<16x1xf32>
    %232 = vector.broadcast %231 : vector<16x1xf32> to vector<16x32xf32>
    %233 = arith.mulf %228, %232 : vector<16x32xf32>
    %234 = vector.broadcast %212 : vector<1x32xf32> to vector<16x32xf32>
    %235 = arith.mulf %233, %234 : vector<16x32xf32>
    %236 = vector.broadcast %213 : vector<1x32xf32> to vector<16x32xf32>
    %237 = arith.addf %235, %236 : vector<16x32xf32>
    %c232 = arith.constant 232 : index
    %c0_62 = arith.constant 0 : index
    %238 = vector.load %arg2[%c232, %c0_62] : memref<560x128xf32, #tpu.memory_space<vmem>>, vector<32x128xf32>
    %cst_63 = arith.constant dense<0.000000e+00> : vector<16x128xf32>
    %239 = tpu.matmul %237, %238, %cst_63 {dimension_numbers = #tpu.dot_dimension_numbers<[1], [0], [0], [1], [0, 0, 1, 1], [], []>} : vector<16x32xf32>, vector<32x128xf32>, vector<16x128xf32> -> vector<16x128xf32>
    %240 = vector.extract_strided_slice %0 {offsets = [1, 0], sizes = [1, 128], strides = [1, 1]} : vector<8x128xf32> to vector<1x128xf32>
    %241 = vector.broadcast %240 : vector<1x128xf32> to vector<16x128xf32>
    %242 = arith.addf %239, %241 : vector<16x128xf32>
    %243 = vector.extract_strided_slice %242 {offsets = [0, 0], sizes = [16, 16], strides = [1, 1]} : vector<16x128xf32> to vector<16x16xf32>
    %cst_64 = arith.constant dense<0xFF800000> : vector<16xf32>
    %244 = vector.multi_reduction <maximumf>, %243, %cst_64 [1] : vector<16x16xf32> to vector<16xf32>
    %245 = vector.shape_cast %244 : vector<16xf32> to vector<16x1xf32>
    %246 = vector.broadcast %245 : vector<16x1xf32> to vector<16x16xf32>
    %247 = arith.subf %243, %246 : vector<16x16xf32>
    %248 = math.exp %247 : vector<16x16xf32>
    %cst_65 = arith.constant dense<0.000000e+00> : vector<16xf32>
    %249 = vector.multi_reduction <add>, %248, %cst_65 [1] : vector<16x16xf32> to vector<16xf32>
    %250 = vector.shape_cast %249 : vector<16xf32> to vector<16x1xf32>
    %251 = tpu.reciprocal %250 {approx = true} : vector<16x1xf32> -> vector<16x1xf32>
    %252 = vector.broadcast %251 : vector<16x1xf32> to vector<16x16xf32>
    %253 = arith.mulf %248, %252 : vector<16x16xf32>
    %c0_66 = arith.constant 0 : index
    %c0_67 = arith.constant 0 : index
    %254 = vector.load %arg1[%c0_66, %c0_67] : memref<16x1xf32, #tpu.memory_space<vmem>>, vector<16x1xf32>
    %255 = vector.broadcast %254 : vector<16x1xf32> to vector<16x16xf32>
    %256 = arith.mulf %253, %255 : vector<16x16xf32>
    %cst_68 = arith.constant dense<0.000000e+00> : vector<16x16xf32>
    %257 = tpu.matmul %2, %256, %cst_68 {dimension_numbers = #tpu.dot_dimension_numbers<[1], [0], [0], [1], [0, 0, 1, 1], [], []>} : vector<16x16xf32>, vector<16x16xf32>, vector<16x16xf32> -> vector<16x16xf32>
    %cst_69 = arith.constant 9.99999993E-9 : f32
    %258 = vector.broadcast %cst_69 : f32 to vector<16x16xf32>
    %259 = arith.addf %257, %258 : vector<16x16xf32>
    %260 = tpu.reciprocal %259 {approx = true} : vector<16x16xf32> -> vector<16x16xf32>
    %261 = arith.mulf %256, %260 : vector<16x16xf32>
    %262 = arith.mulf %243, %261 : vector<16x16xf32>
    %c264 = arith.constant 264 : index
    %c0_70 = arith.constant 0 : index
    %263 = vector.load %arg2[%c264, %c0_70] : memref<560x128xf32, #tpu.memory_space<vmem>>, vector<16x128xf32>
    %cst_71 = arith.constant dense<0.000000e+00> : vector<16x128xf32>
    %264 = tpu.matmul %262, %263, %cst_71 {dimension_numbers = #tpu.dot_dimension_numbers<[1], [0], [0], [1], [0, 0, 1, 1], [], []>} : vector<16x16xf32>, vector<16x128xf32>, vector<16x128xf32> -> vector<16x128xf32>
    %265 = vector.extract_strided_slice %0 {offsets = [2, 0], sizes = [1, 128], strides = [1, 1]} : vector<8x128xf32> to vector<1x128xf32>
    %266 = vector.broadcast %265 : vector<1x128xf32> to vector<16x128xf32>
    %267 = arith.addf %264, %266 : vector<16x128xf32>
    %c0_72 = arith.constant 0 : index
    %c0_73 = arith.constant 0 : index
    %268 = vector.load %arg3[%c0_72, %c0_73] : memref<16x128xf32, #tpu.memory_space<vmem>>, vector<16x128xf32>
    tpu.vector_store %arg3[%c0_72, %c0_73], %267 {strides = array<i32>} : memref<16x128xf32, #tpu.memory_space<vmem>>, vector<16x128xf32>,
    return
  }
}

</mosaic_0001>

<bundles_post_ra>
// kernel: tpu_custom_call.1
= control target key start
LH: loop header
LB: loop body
LE: loop exit
PB: predicated region body
PF: predicated region fallthrough
CT: control target
= control target key end

     0   :  { %8 = vsyncpa [#allocation3], 0  ;;  %s3152_s0 = inlined_call_operand.hbm [shape: f32[16,232], index: 0, kind: input, shape index: {}]   ;;  %s3153_s1 = inlined_call_operand.vmem [shape: f32[16,1], index: 1, kind: input, shape index: {}]   ;;  %s3154_s2 = inlined_call_operand.hbm [shape: f32[560,128], index: 2, kind: input, shape index: {}]   ;;  %s3155_s3 = inlined_call_operand.hbm [shape: f32[16,128], index: 3, kind: output, shape index: {}]  }
   0x1   :  { %9 = vsyncpa [#allocation6], 0 }
   0x2   :  { %10 = vsyncpa [#allocation4], 0  ;;  %s2822_s12 = smov [#allocation2]   ;;  %s2750_s16 = scalar_lea.hbm %s3152_s0, 512 }
   0x3   :  { %s16_s13 = sshll.u32 %s2822_s12, 4  ;;  %p2751_p0 = scmp.ne.s32.totalorder %s3152_s0, %s2750_s16  ;;  %s17_s13 = int_to_ptr.vmem [resolvable:$true] %s16_s13 }
   0x4   :  { %p2754_p1 = scmp.lt.u32.totalorder %s2750_s16, %s3152_s0 }
   0x6   :  { %p2756_p2 = pnand %p2754_p1, %p2751_p0 }
   0x8   :  { %2759 = shalt.err (!%p2756_p2)
}
   0x9   :  { %s2760_s21 = scalar_lea.vmem %s17_s13, 512  ;;  %p2765_p4 = scmp.lt.s32.totalorder %s17_s13, %s17_s13 }
   0xa   :  { %p2761_p3 = scmp.ne.s32.totalorder %s17_s13, %s2760_s21  ;;  %p2766_p5 = scmp.lt.s32.totalorder %s2760_s21, %s2760_s21 }
   0xc   :  { %p2767_p6 = por %p2766_p5, %p2765_p4 }
   0xe   :  { %p2768_p7 = pnand %p2767_p6, %p2761_p3 }
  0x10   :  { %2771 = shalt.err (!%p2768_p7)
}
  0x11   :  { %s2823_s22 = smov 256   ;;  %s2824_s23 = smov 16  }
  0x12   :  { %22 = dma.hbm_to_vmem [thread:$0]  %s3152_s0, 512, %s17_s13, [#allocation3], %s2823_s22, %s2823_s22, %s2824_s23  }
  0x13   :  { %s2825_s26 = smov [#allocation5]   ;;  %s2772_s30 = scalar_lea.hbm %s3154_s2, 8960 }
  0x14   :  { %s30_s27 = sshll.u32 %s2825_s26, 4  ;;  %p2773_p8 = scmp.ne.s32.totalorder %s3154_s2, %s2772_s30  ;;  %s31_s27 = int_to_ptr.vmem [resolvable:$true] %s30_s27 }
  0x15   :  { %p2776_p9 = scmp.lt.u32.totalorder %s2772_s30, %s3154_s2 }
  0x17   :  { %p2778_p10 = pnand %p2776_p9, %p2773_p8 }
  0x19   :  { %2781 = shalt.err (!%p2778_p10)
}
  0x1a   :  { %s2782_s8 = scalar_lea.vmem %s31_s27, 8960  ;;  %p2787_p12 = scmp.lt.s32.totalorder %s31_s27, %s31_s27 }
  0x1b   :  { %p2783_p11 = scmp.ne.s32.totalorder %s31_s27, %s2782_s8  ;;  %p2788_p13 = scmp.lt.s32.totalorder %s2782_s8, %s2782_s8 }
  0x1d   :  { %p2789_p0 = por %p2788_p13, %p2787_p12 }
  0x1f   :  { %p2790_p1 = pnand %p2789_p0, %p2783_p11 }
  0x21   :  { %2793 = shalt.err (!%p2790_p1)
}
  0x22   :  { %s2826_s0 = smov 128   ;;  %s2827_s9 = smov 8  }
  0x23   :  { %36 = dma.hbm_to_vmem [thread:$0]  %s3154_s2, 8960, %s31_s27, [#allocation6], %s2826_s0, %s2826_s0, %s2827_s9  }
  0x24   :  { %2816 = dma.done.wait [#allocation3], 512  }
  0x25   :  { %2817 = vsyncadd [#allocation3], 4294966784 }
  0x26   :  { %2818 = dma.done.wait [#allocation6], 8960  }
  0x27   :  { %2819 = vsyncadd [#allocation6], 4294958336  ;;  %v2828_v0 = vmov 0.0|0.0   ;;  %v52_v1 = vld [vmem:[#allocation5] sm:$0xff]  ;;  %v53_v2 = vld [vmem:[#allocation5 + $0x8] sm:$0xff]  ;;  %vm85_vm0 = vcmask 850944   ;;  %v81_v55 = vlaneseq }
  0x28   :  { %2478 = vmatprep.subr.bf16.mxu0 %v2828_v0  ;;  %v54_v3 = vld [vmem:[#allocation5 + $0x10] sm:$0xff]  ;;  %v2479_v4 = vpack.c.bf16 %v53_v2, %v52_v1  ;;  %v55_v5 = vld [vmem:[#allocation5 + $0x18] sm:$0xff]  ;;  %v56_v7 = vld [vmem:[#allocation5 + $0x20] sm:$0xff]  ;;  %v2829_v47 = vmov 0.0   ;;  %vm186_vm1 = vcmask 261120   ;;  %vm274_vm2 = vcmask 130048  }
  0x29   :  { %v2482_v6 = vpack.c.bf16 %v55_v5, %v54_v3  ;;  %v57_v8 = vld [vmem:[#allocation5 + $0x28] sm:$0xff]  ;;  %v58_v10 = vld [vmem:[#allocation5 + $0x30] sm:$0xff]  ;;  %v59_v11 = vld [vmem:[#allocation5 + $0x38] sm:$0xff]  ;;  %v2901_v56 = vshrl.u32 %v81_v55, 7  ;;  %s2830_s2 = smov 96   ;;  %s2831_s12 = smov 64  }
  0x2a   :  { %2480 = vmatpush1.bf16.msra.mxu0 %v2479_v4  ;;  %v2485_v9 = vpack.c.bf16 %v57_v8, %v56_v7  ;;  %v49_v12 = vld [vmem:[#allocation2 + $0x8] sm:$0xff]  ;;  %v2488_v13 = vpack.c.bf16 %v59_v11, %v58_v10  ;;  %v167_v14 = vld [vmem:[#allocation5 + $0x140] sm:$0xff]  ;;  %v62_v20 = vld [vmem:[#allocation5 + $0x50] sm:$0xff]  ;;  %s2832_s13 = smov 80   ;;  %s2833_s14 = smov 112  }
  0x2b   :  { %2481 = vmatprep.subr.bf16.mxu0 %v2828_v0  ;;  %2179 = vmatprep.mubr.msk.f32.mxu0 %vm85_vm0, %v49_v12  ;;  %v168_v15 = vld [vmem:[#allocation5 + $0x148] sm:$0xff]  ;;  %v60_v16 = vld [vmem:[#allocation5 + $0x40] sm:$0xff]  ;;  %v63_v21 = vld [vmem:[#allocation5 + $0x58] sm:$0xff]  ;;  %v2904_v57 = vsub.s32 0, %v2901_v56  ;;  %s2834_s15 = smov 48  }
  0x2c   :  { %v61_v17 = vld [vmem:[#allocation5 + $0x48] sm:$0xff]  ;;  %v2520_v18 = vpack.c.bf16 %v168_v15, %v167_v14  ;;  %v2494_v22 = vpack.c.bf16 %v63_v21, %v62_v20  ;;  %v64_v23 = vld [vmem:[#allocation5 + $0x60] sm:$0xff]  ;;  %v66_v26 = vld [vmem:[#allocation5 + $0x70] sm:$0xff] }
  0x2d   :  { %v2491_v19 = vpack.c.bf16 %v61_v17, %v60_v16  ;;  %v65_v24 = vld [vmem:[#allocation5 + $0x68] sm:$0xff]  ;;  %v67_v27 = vld [vmem:[#allocation5 + $0x78] sm:$0xff]  ;;  %v68_v29 = vld [vmem:[#allocation5 + $0x80] sm:$0xff] }
  0x2e   :  { %2483 = vmatpush1.bf16.msra.mxu0 %v2482_v6  ;;  %2521 = vmatprep.subr.bf16.mxu1 %v2520_v18  ;;  %v2497_v25 = vpack.c.bf16 %v65_v24, %v64_v23  ;;  %v2500_v28 = vpack.c.bf16 %v67_v27, %v66_v26  ;;  %v69_v30 = vld [vmem:[#allocation5 + $0x88] sm:$0xff]  ;;  %v70_v32 = vld [vmem:[#allocation5 + $0x90] sm:$0xff]  ;;  %v71_v33 = vld [vmem:[#allocation5 + $0x98] sm:$0xff] }
  0x2f   :  { %2484 = vmatprep.subr.bf16.mxu0 %v2828_v0  ;;  %2523 = vmatpush3.bf16.msra.mxu1 %v2520_v18  ;;  %v2503_v31 = vpack.c.bf16 %v69_v30, %v68_v29  ;;  %v2506_v34 = vpack.c.bf16 %v71_v33, %v70_v32  ;;  %v72_v35 = vld [vmem:[#allocation5 + $0xa0] sm:$0xff]  ;;  %v73_v36 = vld [vmem:[#allocation5 + $0xa8] sm:$0xff]  ;;  %v74_v38 = vld [vmem:[#allocation5 + $0xb0] sm:$0xff] }
  0x30   :  { %v2509_v37 = vpack.c.bf16 %v73_v36, %v72_v35  ;;  %v75_v39 = vld [vmem:[#allocation5 + $0xb8] sm:$0xff]  ;;  %v76_v41 = vld [vmem:[#allocation5 + $0xc0] sm:$0xff]  ;;  %v77_v42 = vld [vmem:[#allocation5 + $0xc8] sm:$0xff] }
  0x31   :  { %v2512_v40 = vpack.c.bf16 %v75_v39, %v74_v38  ;;  %v2515_v43 = vpack.c.bf16 %v77_v42, %v76_v41  ;;  %v78_v44 = vld [vmem:[#allocation5 + $0xd0] sm:$0xff]  ;;  %v79_v45 = vld [vmem:[#allocation5 + $0xd8] sm:$0xff]  ;;  %v80_v48 = vld [vmem:[#allocation5 + $0xe0] sm:$0xff] }
  0x32   :  { %2486 = vmatpush1.bf16.msra.mxu0 %v2485_v9  ;;  %v2518_v46 = vpack.c.bf16 %v79_v45, %v78_v44  ;;  %v48_v49 = vld [vmem:[#allocation2] sm:$0xff]  ;;  %v51_v50 = vld [vmem:[#allocation2 + $0x18] sm:$0xff]  ;;  %v50_v51 = vld [vmem:[#allocation2 + $0x10] sm:$0xff] }
  0x33   :  { %2487 = vmatprep.subr.bf16.mxu0 %v2828_v0  ;;  %v169_v52 = vld [vmem:[#allocation5 + $0x150] sm:$0xff]  ;;  %v170_v53 = vld [vmem:[#allocation5 + $0x158] sm:$0xff]  ;;  %vm2926_vm3 = vmpackc.low %vm274_vm2, %vm274_vm2 }
  0x34   :  { %v2524_v54 = vpack.c.bf16 %v170_v53, %v169_v52  ;;  %v43_v58 = vld [vmem:[#allocation5 + $0x118] sm:$0xff]  ;;  %v2915_v2 = vld [vmem:[#allocation5 + $0x1b0] sm:$0xff] }
  0x35   :  { %v84_v59 = vrot.slane %v43_v58, %v2904_v57  ;;  %v185_v3 = vrot.slane %v2915_v2, %v2904_v57  ;;  %v2935_v14 = vld [vmem:[#allocation5 + $0x138] sm:$0xff]  ;;  %v2937_v15 = vld [vmem:[#allocation5 + $0x130] sm:$0xff] }
  0x36   :  { %2489 = vmatpush1.bf16.msra.mxu0 %v2488_v13  ;;  %2525 = vmatprep.subr.bf16.mxu1 %v2524_v54 }
  0x37   :  { %2490 = vmatprep.subr.bf16.mxu0 %v2828_v0  ;;  %2527 = vmatpush3.bf16.msra.mxu1 %v2524_v54 }
  0x3a   :  { %2492 = vmatpush1.bf16.msra.mxu0 %v2491_v19 }
  0x3b   :  { %2493 = vmatprep.subr.bf16.mxu0 %v2828_v0 }
  0x3e   :  { %2495 = vmatpush1.bf16.msra.mxu0 %v2494_v22 }
  0x3f   :  { %2496 = vmatprep.subr.bf16.mxu0 %v2828_v0 }
  0x42   :  { %2498 = vmatpush1.bf16.msra.mxu0 %v2497_v25 }
  0x43   :  { %2499 = vmatprep.subr.bf16.mxu0 %v2828_v0 }
  0x46   :  { %2501 = vmatpush1.bf16.msra.mxu0 %v2500_v28 }
  0x47   :  { %2502 = vmatprep.subr.bf16.mxu0 %v2828_v0 }
  0x4a   :  { %2504 = vmatpush1.bf16.msra.mxu0 %v2503_v31 }
  0x4b   :  { %2505 = vmatprep.subr.bf16.mxu0 %v2828_v0 }
  0x4e   :  { %2507 = vmatpush1.bf16.msra.mxu0 %v2506_v34 }
  0x4f   :  { %2508 = vmatprep.subr.bf16.mxu0 %v2828_v0 }
  0x52   :  { %2510 = vmatpush1.bf16.msra.mxu0 %v2509_v37 }
  0x53   :  { %2511 = vmatprep.subr.bf16.mxu0 %v2828_v0 }
  0x56   :  { %2513 = vmatpush1.bf16.msra.mxu0 %v2512_v40 }
  0x57   :  { %2514 = vmatprep.subr.bf16.mxu0 %v2828_v0 }
  0x5a   :  { %2516 = vmatpush1.bf16.msra.mxu0 %v2515_v43 }
  0x5b   :  { %2517 = vmatprep.subr.bf16.mxu0 %v2828_v0 }
  0x5e   :  { %2519 = vmatpush1.bf16.msra.mxu0 %v2518_v46 }
  0x5f   :  { %148 = vmatprep.subr.mxu0 %v2829_v47 }
  0x62   :  { %149 = vmatpush1.msra.mxu0 %v80_v48 }
  0x63   :  { %157 = vmatmul.mubr.f32.vlgmr.msra.gmra.mrb[0].mxu0 %v48_v49 }
  0x64   :  { %2180 = vmatprep.mubr.msk.f32.mxu0 %vm85_vm0, %v51_v50 }
  0x67   :  { %162 = vmatmul.mubr.f32.gmra.mrb[2].mxu0 %v50_v51 }
 0x136   :  { %v158_v60 = vpop.f32.mrb[0].mxu0 }
 0x137   :  { %v2907_v61 = vadd.f32 %v158_v60, %v84_v59  ;;  %v160_v62 = vpop.f32.mrb[1].mxu0 }
 0x139   :  { %2325 = vmatprep.mubr.msk.f32.mxu1 %vm186_vm1, %v2907_v61 }
 0x13a   :  { %v163_v63 = vpop.f32.mrb[2].mxu0 }
 0x13b   :  { %v2911_v0 = vadd.f32 %v163_v63, %v84_v59  ;;  %v165_v1 = vpop.f32.mrb[3].mxu0 }
 0x13d   :  { %2326 = vmatmul.mubr.msk.f32.vlgmr.msra.gmra.mrb[0].mxu1 %vm186_vm1, %v2911_v0 }
 0x210   :  { %v2327_v4 = vpop.f32.mrb[0].mxu1 }
 0x211   :  { %v265_v5 = vadd.f32 %v2327_v4, %v185_v3  ;;  %v259_v6 = vpop.f32.mrb[1].mxu1 }
 0x212   :  { %v260_v7 = vadd.f32 %v259_v6, %v185_v3 }
 0x214   :  { %2332 = vmatprep.mubr.msk.f32.mxu1 %vm274_vm2, %v260_v7  ;;  %v2920_v8 = vpack.i.bf16 %v265_v5, %v260_v7 }
 0x216   :  { %2648 = vrot.lane.b32.xlu0 %v2920_v8, %s2830_s2 }
 0x288   :  { %v2649_v9 = vpop.permute.xlu0 %2648 }
 0x289   :  { %v2651_v10 = vunpack.i.h.bf16 %v2649_v9  ;;  %v2650_v11 = vunpack.i.l.bf16 %v2649_v9 }
 0x28b   :  { %v2528_v13 = vpack.c.bf16 %v2651_v10, %v2650_v11 }
 0x28d   :  { %2530 = vmatprep.subr.msk.bf16.mxu1 %vm2926_vm3, %v2528_v13 }
 0x28e   :  { %2533 = vmatpush3.bf16.xpose.msk.msra.mxu1 %vm2926_vm3, %v2528_v13 }
 0x295   :  { %2333 = vmatmul.mubr.msk.f32.vlgmr.msra.gmra.mrb[2].mxu1 %vm274_vm2, %v265_v5 }
 0x368   :  { %v2334_v16 = vpop.f32.mrb[2].mxu1 }
 0x369   :  { %v355_v17 = vadd.f32 %v2334_v16, %v2935_v14  ;;  %v349_v18 = vpop.f32.mrb[3].mxu1 }
 0x36a   :  { %v350_v19 = vadd.f32 %v349_v18, %v2937_v15 }
 0x36b   :  { %v361_v20 = vsel %vm274_vm2, %v355_v17, -inf }
 0x36c   :  { %362 = vmax.xlane.f32.xlu1 %v361_v20  ;;  %v358_v21 = vsel %vm274_vm2, %v350_v19, -inf }
 0x36d   :  { %359 = vmax.xlane.f32.xlu0 %v358_v21  ;;  %v171_v21 = vld [vmem:[#allocation5 + $0x160] sm:$0xff] }
 0x37d   :  { %2653 = vrot.lane.b32.xlu1 %v2920_v8, %s2831_s12 }
 0x381   :  { %2658 = vrot.lane.b32.xlu1 %v2920_v8, %s2832_s13 }
 0x383   :  { %469 = vrot.lane.b32.xlu0 %v265_v5, %s2833_s14 }
 0x3f9   :  { %v363_v22 = vpop.xlane.xlu1 %362 }
 0x3fa   :  { %v365_v23 = vsub.f32 %v355_v17, %v363_v22  ;;  %v360_v24 = vpop.xlane.xlu0 %359  ;;  %v173_v22 = vld [vmem:[#allocation5 + $0x170] sm:$0xff] }
 0x3fb   :  { %v364_v25 = vsub.f32 %v350_v19, %v360_v24  ;;  %v174_v24 = vld [vmem:[#allocation5 + $0x178] sm:$0xff] }
 0x3fc   :  { %v368_v26 = vmul.f32 1.442695, %v365_v23 }
 0x3fd   :  { %v366_v27 = vmul.f32 1.442695, %v364_v25  ;;  %v2654_v28 = vpop.permute.xlu1 %2653  ;;  %v2552_v25 = vpack.c.bf16 %v174_v24, %v173_v22 }
 0x3fe   :  { %2689 = vpow2.f32 %v368_v26  ;;  %v2656_v29 = vunpack.i.h.bf16 %v2654_v28  ;;  %v2655_v30 = vunpack.i.l.bf16 %v2654_v28  ;;  %v470_v47 = vpop.permute.xlu0 %469 }
 0x3ff   :  { %2691 = vpow2.f32 %v366_v27 }
 0x400   :  { %v2534_v31 = vpack.c.bf16 %v2656_v29, %v2655_v30 }
 0x401   :  { %v2659_v32 = vpop.permute.xlu1 %2658 }
 0x402   :  { %v2661_v33 = vunpack.i.h.bf16 %v2659_v32  ;;  %v2660_v34 = vunpack.i.l.bf16 %v2659_v32  ;;  %2535 = vmatprep.subr.bf16.mxu1 %v2534_v31  ;;  %v2976_v32 = vsub.s32 1, %v2901_v56 }
 0x403   :  { %2537 = vmatpush3.bf16.msra.mxu1 %v2534_v31 }
 0x404   :  { %v2538_v35 = vpack.c.bf16 %v2661_v33, %v2660_v34  ;;  %v680_v33 = vrot.slane %v2915_v2, %v2976_v32 }
 0x406   :  { %2540 = vmatprep.subr.msk.bf16.mxu1 %vm2926_vm3, %v2538_v35 }
 0x408   :  { %v2690_v36 = vpop.eup %2689 }
 0x409   :  { %v373_v37 = vsel %vm274_vm2, %v2690_v36, 0.0  ;;  %v2692_v38 = vpop.eup %2691 }
 0x40a   :  { %374 = vadd.xlane.f32.xlu1 %v373_v37  ;;  %v370_v39 = vsel %vm274_vm2, %v2692_v38, 0.0 }
 0x40e   :  { %371 = vadd.xlane.f32.xlu1 %v370_v39 }
 0x41f   :  { %467 = vrot.lane.b32.xlu1 %v260_v7, %s2833_s14 }
 0x497   :  { %v375_v40 = vpop.xlane.xlu1 %374 }
 0x498   :  { %2693 = vrcp.f32 %v375_v40 }
 0x49b   :  { %v372_v41 = vpop.xlane.xlu1 %371 }
 0x49c   :  { %2695 = vrcp.f32 %v372_v41 }
 0x49f   :  { %v468_v46 = vpop.permute.xlu1 %467 }
 0x4a2   :  { %v2694_v42 = vpop.eup %2693 }
 0x4a3   :  { %v379_v45 = vmul.f32 %v2694_v42, %v2690_v36 }
 0x4a6   :  { %v2696_v43 = vpop.eup %2695 }
 0x4a7   :  { %v378_v44 = vmul.f32 %v2696_v43, %v2692_v38 }
 0x4a9   :  { %2339 = vmatprep.mubr.msk.f32.mxu1 %vm274_vm2, %v378_v44 }
 0x4aa   :  { %2340 = vmatmul.mubr.msk.f32.vlgmr.msra.gmra.mrb[4].mxu1 %vm274_vm2, %v379_v45 }
 0x4ab   :  { %2543 = vmatpush3.bf16.xpose.msk.msra.mxu1 %vm2926_vm3, %v2538_v35  ;;  %2346 = vmatprep.mubr.msk.f32.mxu1 %vm274_vm2, %v468_v46 }
 0x4b2   :  { %2347 = vmatmul.mubr.msk.f32.vlgmr.msra.gmra.mrb[6].mxu1 %vm274_vm2, %v470_v47 }
 0x57d   :  { %v2341_v48 = vpop.f32.mrb[4].mxu1 }
 0x57e   :  { %v458_v49 = vpop.f32.mrb[5].mxu1 }
 0x585   :  { %v2348_v50 = vpop.f32.mrb[6].mxu1 }
 0x586   :  { %v555_v51 = vadd.f32 %v2348_v50, %v2935_v14  ;;  %v549_v52 = vpop.f32.mrb[7].mxu1 }
 0x587   :  { %v550_v53 = vadd.f32 %v549_v52, %v2937_v15 }
 0x588   :  { %v561_v54 = vsel %vm274_vm2, %v555_v51, -inf }
 0x589   :  { %562 = vmax.xlane.f32.xlu0 %v561_v54  ;;  %v558_v55 = vsel %vm274_vm2, %v550_v53, -inf  ;;  %v178_v54 = vld [vmem:[#allocation5 + $0x198] sm:$0xff] }
 0x58a   :  { %559 = vmax.xlane.f32.xlu1 %v558_v55 }
 0x616   :  { %v563_v58 = vpop.xlane.xlu0 %562 }
 0x617   :  { %v565_v59 = vsub.f32 %v555_v51, %v563_v58  ;;  %v560_v60 = vpop.xlane.xlu1 %559  ;;  %v176_v51 = vld [vmem:[#allocation5 + $0x188] sm:$0xff] }
 0x618   :  { %v564_v62 = vsub.f32 %v550_v53, %v560_v60  ;;  %v177_v53 = vld [vmem:[#allocation5 + $0x190] sm:$0xff] }
 0x619   :  { %v568_v63 = vmul.f32 1.442695, %v565_v59  ;;  %v2560_v55 = vpack.c.bf16 %v178_v54, %v177_v53 }
 0x61a   :  { %v566_v1 = vmul.f32 1.442695, %v564_v62 }
 0x61b   :  { %2697 = vpow2.f32 %v568_v63 }
 0x61c   :  { %2699 = vpow2.f32 %v566_v1 }
 0x625   :  { %v2698_v3 = vpop.eup %2697 }
 0x626   :  { %v573_v4 = vsel %vm274_vm2, %v2698_v3, 0.0  ;;  %v2700_v5 = vpop.eup %2699 }
 0x627   :  { %574 = vadd.xlane.f32.xlu1 %v573_v4  ;;  %v570_v6 = vsel %vm274_vm2, %v2700_v5, 0.0  ;;  %v799_v4 = vsub.s32 3, %v2901_v56 }
 0x62b   :  { %571 = vadd.xlane.f32.xlu1 %v570_v6 }
 0x63c   :  { %2663 = vrot.lane.b32.xlu1 %v2920_v8, %s2834_s15  ;;  %v172_v8 = vld [vmem:[#allocation5 + $0x168] sm:$0xff] }
 0x63d   :  { %v2548_v23 = vpack.c.bf16 %v172_v8, %v171_v21  ;;  %v805_v8 = vsub.s32 4, %v2901_v56 }
 0x63f   :  { %v806_v22 = vrot.slane %v2915_v2, %v805_v8 }
 0x6b4   :  { %v575_v7 = vpop.xlane.xlu1 %574 }
 0x6b5   :  { %2701 = vrcp.f32 %v575_v7 }
 0x6b8   :  { %v572_v9 = vpop.xlane.xlu1 %571 }
 0x6b9   :  { %2703 = vrcp.f32 %v572_v9 }
 0x6bc   :  { %v2664_v10 = vpop.permute.xlu1 %2663 }
 0x6bd   :  { %v2666_v11 = vunpack.i.h.bf16 %v2664_v10  ;;  %v2665_v13 = vunpack.i.l.bf16 %v2664_v10 }
 0x6bf   :  { %v2544_v16 = vpack.c.bf16 %v2666_v11, %v2665_v13  ;;  %v2702_v17 = vpop.eup %2701  ;;  %v800_v11 = vrot.slane %v2915_v2, %v799_v4 }
 0x6c0   :  { %v579_v20 = vmul.f32 %v2702_v17, %v2698_v3  ;;  %v2987_v3 = vsub.s32 2, %v2901_v56 }
 0x6c1   :  { %2545 = vmatprep.subr.bf16.mxu1 %v2544_v16 }
 0x6c2   :  { %2547 = vmatpush3.bf16.msra.mxu1 %v2544_v16 }
 0x6c3   :  { %v2704_v18 = vpop.eup %2703  ;;  %2549 = vmatprep.subr.bf16.mxu1 %v2548_v23 }
 0x6c4   :  { %v578_v19 = vmul.f32 %v2704_v18, %v2700_v5  ;;  %v794_v5 = vrot.slane %v2915_v2, %v2987_v3 }
 0x6c6   :  { %2353 = vmatprep.mubr.msk.f32.mxu1 %vm274_vm2, %v578_v19  ;;  %v179_v19 = vld [vmem:[#allocation5 + $0x1a0] sm:$0xff] }
 0x6c7   :  { %2354 = vmatmul.mubr.msk.f32.vlgmr.msra.gmra.mrb[8].mxu1 %vm274_vm2, %v579_v20  ;;  %v180_v20 = vld [vmem:[#allocation5 + $0x1a8] sm:$0xff] }
 0x6c8   :  { %2551 = vmatpush3.bf16.msra.mxu1 %v2548_v23  ;;  %v2564_v21 = vpack.c.bf16 %v180_v20, %v179_v19  ;;  %v3027_v19 = vld [vmem:[#allocation5 + $0x228] sm:$0xff] }
 0x6c9   :  { %2553 = vmatprep.subr.bf16.mxu1 %v2552_v25  ;;  %v1033_v20 = vrot.slane %v3027_v19, %v2904_v57 }
 0x6cc   :  { %2555 = vmatpush3.bf16.msra.mxu1 %v2552_v25 }
 0x79a   :  { %v2355_v26 = vpop.f32.mrb[8].mxu1 }
 0x79b   :  { %671 = vrot.lane.b32.xlu1 %v2355_v26, %s2824_s23  ;;  %v658_v27 = vpop.f32.mrb[9].mxu1 }
 0x79c   :  { %669 = vrot.lane.b32.xlu0 %v658_v27, %s2824_s23 }
 0x80d   :  { %v672_v28 = vpop.permute.xlu1 %671 }
 0x80e   :  { %v670_v29 = vpop.permute.xlu0 %669  ;;  %v676_v31 = vsel %vm274_vm2, %v2341_v48, %v672_v28 }
 0x80f   :  { %v675_v30 = vsel %vm274_vm2, %v458_v49, %v670_v29  ;;  %v892_v29 = vsub.s32 5, %v2901_v56 }
 0x810   :  { %2364 = vmatprep.mubr.msk.f32.mxu1 %vm186_vm1, %v675_v30 }
 0x811   :  { %2365 = vmatmul.mubr.msk.f32.vlgmr.msra.gmra.mrb[10].mxu1 %vm186_vm1, %v676_v31  ;;  %v893_v30 = vrot.slane %v2915_v2, %v892_v29 }
 0x8e4   :  { %v2366_v34 = vpop.f32.mrb[10].mxu1 }
 0x8e5   :  { %v759_v35 = vadd.f32 %v2366_v34, %v680_v33  ;;  %v753_v36 = vpop.f32.mrb[11].mxu1 }
 0x8e6   :  { %v754_v37 = vadd.f32 %v753_v36, %v680_v33 }
 0x8e7   :  { %v763_v38 = vadd.f32 %v759_v35, %v2911_v0 }
 0x8e8   :  { %v762_v39 = vadd.f32 %v754_v37, %v2907_v61  ;;  %v175_v61 = vld [vmem:[#allocation5 + $0x180] sm:$0xff] }
 0x8e9   :  { %v767_v40 = vsel %vm186_vm1, %v763_v38, 0.0  ;;  %v2556_v52 = vpack.c.bf16 %v176_v51, %v175_v61  ;;  %v1017_v51 = vld [vmem:[#allocation5 + $0x1c8] sm:$0xff] }
 0x8ea   :  { %768 = vadd.xlane.f32.xlu0 %v767_v40  ;;  %v764_v41 = vsel %vm186_vm1, %v762_v39, 0.0 }
 0x8eb   :  { %765 = vadd.xlane.f32.xlu1 %v764_v41  ;;  %2557 = vmatprep.subr.bf16.mxu1 %v2556_v52 }
 0x8ec   :  { %2559 = vmatpush3.bf16.msra.mxu1 %v2556_v52  ;;  %v1018_v52 = vld [vmem:[#allocation5 + $0x1d0] sm:$0xff] }
 0x8ed   :  { %2561 = vmatprep.subr.bf16.mxu1 %v2560_v55  ;;  %v2572_v53 = vpack.c.bf16 %v1018_v52, %v1017_v51 }
 0x8f0   :  { %2563 = vmatpush3.bf16.msra.mxu1 %v2560_v55 }
 0x8f1   :  { %2565 = vmatprep.subr.bf16.mxu1 %v2564_v21 }
 0x977   :  { %v769_v42 = vpop.xlane.xlu0 %768 }
 0x978   :  { %v772_v43 = vmul.f32 0.03125, %v769_v42  ;;  %v766_v44 = vpop.xlane.xlu1 %765 }
 0x979   :  { %v771_v45 = vmul.f32 0.03125, %v766_v44 }
 0x97a   :  { %v774_v46 = vsub.f32 %v763_v38, %v772_v43 }
 0x97b   :  { %v773_v47 = vsub.f32 %v762_v39, %v771_v45 }
 0x97c   :  { %v776_v48 = vmul.f32 %v774_v46, %v774_v46 }
 0x97d   :  { %v775_v49 = vmul.f32 %v773_v47, %v773_v47 }
 0x97e   :  { %v780_v50 = vsel %vm186_vm1, %v776_v48, 0.0 }
 0x97f   :  { %781 = vadd.xlane.f32.xlu0 %v780_v50  ;;  %v777_v0 = vsel %vm186_vm1, %v775_v49, 0.0  ;;  %v1015_v50 = vld [vmem:[#allocation5 + $0x1b8] sm:$0xff] }
 0x980   :  { %778 = vadd.xlane.f32.xlu1 %v777_v0  ;;  %v1016_v0 = vld [vmem:[#allocation5 + $0x1c0] sm:$0xff] }
 0x981   :  { %v2568_v61 = vpack.c.bf16 %v1016_v0, %v1015_v50 }
 0xa0c   :  { %v782_v58 = vpop.xlane.xlu0 %781 }
 0xa0d   :  { %v784_v59 = vmul.f32 0.03125, %v782_v58  ;;  %v779_v60 = vpop.xlane.xlu1 %778 }
 0xa0e   :  { %v783_v62 = vmul.f32 0.03125, %v779_v60 }
 0xa0f   :  { %v786_v63 = vadd.f32 1e-05, %v784_v59 }
 0xa10   :  { %v785_v1 = vadd.f32 1e-05, %v783_v62 }
 0xa11   :  { %2705 = vrsqrt.f32 %v786_v63  ;;  %v1005_v63 = vsub.s32 6, %v2901_v56 }
 0xa12   :  { %2707 = vrsqrt.f32 %v785_v1  ;;  %v1011_v1 = vsub.s32 7, %v2901_v56 }
 0xa1b   :  { %v2706_v6 = vpop.eup %2705 }
 0xa1c   :  { %v2708_v7 = vpop.eup %2707  ;;  %v790_v9 = vmul.f32 %v2706_v6, %v774_v46 }
 0xa1d   :  { %v789_v10 = vmul.f32 %v2708_v7, %v773_v47 }
 0xa1e   :  { %v796_v13 = vmul.f32 %v794_v5, %v790_v9 }
 0xa1f   :  { %v795_v16 = vmul.f32 %v794_v5, %v789_v10  ;;  %v1006_v5 = vrot.slane %v2915_v2, %v1005_v63 }
 0xa20   :  { %v802_v18 = vadd.f32 %v800_v11, %v796_v13 }
 0xa21   :  { %v801_v17 = vadd.f32 %v800_v11, %v795_v16  ;;  %v1012_v11 = vrot.slane %v2915_v2, %v1011_v1 }
 0xa23   :  { %2375 = vmatprep.mubr.msk.f32.mxu1 %vm186_vm1, %v801_v17 }
 0xa24   :  { %2376 = vmatmul.mubr.msk.f32.vlgmr.msra.gmra.mrb[12].mxu1 %vm186_vm1, %v802_v18 }
 0xa25   :  { %2567 = vmatpush3.bf16.msra.mxu1 %v2564_v21 }
 0xa26   :  { %2569 = vmatprep.subr.bf16.mxu1 %v2568_v61 }
 0xaf7   :  { %v2377_v23 = vpop.f32.mrb[12].mxu1 }
 0xaf8   :  { %v885_v24 = vadd.f32 %v2377_v23, %v806_v22  ;;  %v879_v25 = vpop.f32.mrb[13].mxu1 }
 0xaf9   :  { %v880_v26 = vadd.f32 %v879_v25, %v806_v22 }
 0xafa   :  { %v889_v28 = vmax.f32 %v885_v24, 0.0 }
 0xafb   :  { %v888_v27 = vmax.f32 %v880_v26, 0.0 }
 0xafd   :  { %2382 = vmatprep.mubr.msk.f32.mxu1 %vm274_vm2, %v888_v27 }
 0xafe   :  { %2383 = vmatmul.mubr.msk.f32.vlgmr.msra.gmra.mrb[14].mxu1 %vm274_vm2, %v889_v28 }
 0xaff   :  { %2571 = vmatpush3.bf16.msra.mxu1 %v2568_v61 }
 0xb00   :  { %2573 = vmatprep.subr.bf16.mxu1 %v2572_v53 }
 0xb03   :  { %2575 = vmatpush3.bf16.msra.mxu1 %v2572_v53 }
 0xbd1   :  { %v2384_v31 = vpop.f32.mrb[14].mxu1 }
 0xbd2   :  { %v972_v33 = vadd.f32 %v2384_v31, %v893_v30  ;;  %v966_v34 = vpop.f32.mrb[15].mxu1 }
 0xbd3   :  { %v967_v35 = vadd.f32 %v966_v34, %v893_v30 }
 0xbd4   :  { %v976_v36 = vadd.f32 %v972_v33, %v802_v18 }
 0xbd5   :  { %v975_v37 = vadd.f32 %v967_v35, %v801_v17 }
 0xbd6   :  { %v980_v38 = vsel %vm186_vm1, %v976_v36, 0.0 }
 0xbd7   :  { %981 = vadd.xlane.f32.xlu0 %v980_v38  ;;  %v977_v39 = vsel %vm186_vm1, %v975_v37, 0.0 }
 0xbd8   :  { %978 = vadd.xlane.f32.xlu1 %v977_v39 }
 0xc64   :  { %v982_v40 = vpop.xlane.xlu0 %981 }
 0xc65   :  { %v984_v41 = vmul.f32 0.03125, %v982_v40  ;;  %v979_v42 = vpop.xlane.xlu1 %978 }
 0xc66   :  { %v983_v43 = vmul.f32 0.03125, %v979_v42 }
 0xc67   :  { %v986_v44 = vsub.f32 %v976_v36, %v984_v41 }
 0xc68   :  { %v985_v45 = vsub.f32 %v975_v37, %v983_v43 }
 0xc69   :  { %v988_v46 = vmul.f32 %v986_v44, %v986_v44 }
 0xc6a   :  { %v987_v47 = vmul.f32 %v985_v45, %v985_v45 }
 0xc6b   :  { %v992_v48 = vsel %vm186_vm1, %v988_v46, 0.0 }
 0xc6c   :  { %993 = vadd.xlane.f32.xlu0 %v992_v48  ;;  %v989_v49 = vsel %vm186_vm1, %v987_v47, 0.0 }
 0xc6d   :  { %990 = vadd.xlane.f32.xlu1 %v989_v49 }
 0xcf9   :  { %v994_v54 = vpop.xlane.xlu0 %993 }
 0xcfa   :  { %v996_v55 = vmul.f32 0.03125, %v994_v54  ;;  %v991_v58 = vpop.xlane.xlu1 %990 }
 0xcfb   :  { %v995_v59 = vmul.f32 0.03125, %v991_v58 }
 0xcfc   :  { %v998_v60 = vadd.f32 1e-05, %v996_v55 }
 0xcfd   :  { %v997_v62 = vadd.f32 1e-05, %v995_v59 }
 0xcfe   :  { %2709 = vrsqrt.f32 %v998_v60 }
 0xcff   :  { %2711 = vrsqrt.f32 %v997_v62 }
 0xd08   :  { %v2710_v6 = vpop.eup %2709 }
 0xd09   :  { %v2712_v7 = vpop.eup %2711  ;;  %v1002_v9 = vmul.f32 %v2710_v6, %v986_v44 }
 0xd0a   :  { %v1001_v10 = vmul.f32 %v2712_v7, %v985_v45 }
 0xd0b   :  { %v1008_v13 = vmul.f32 %v1006_v5, %v1002_v9 }
 0xd0c   :  { %v1007_v16 = vmul.f32 %v1006_v5, %v1001_v10 }
 0xd0d   :  { %v3021_v18 = vadd.f32 %v1012_v11, %v1008_v13 }
 0xd0e   :  { %v3019_v17 = vadd.f32 %v1012_v11, %v1007_v16 }
 0xd10   :  { %2393 = vmatprep.mubr.msk.f32.mxu1 %vm186_vm1, %v3019_v17 }
 0xd11   :  { %2394 = vmatmul.mubr.msk.f32.vlgmr.msra.gmra.mrb[16].mxu1 %vm186_vm1, %v3021_v18 }
 0xde4   :  { %v2395_v21 = vpop.f32.mrb[16].mxu1 }
 0xde5   :  { %v1112_v22 = vadd.f32 %v2395_v21, %v1033_v20  ;;  %v1106_v2 = vpop.f32.mrb[17].mxu1 }
 0xde6   :  { %v1107_v23 = vadd.f32 %v1106_v2, %v1033_v20 }
 0xde8   :  { %2400 = vmatprep.mubr.msk.f32.mxu0 %vm274_vm2, %v1107_v23  ;;  %v3032_v24 = vpack.i.bf16 %v1112_v22, %v1107_v23 }
 0xdea   :  { %2668 = vrot.lane.b32.xlu1 %v3032_v24, %s2830_s2 }
 0xdee   :  { %2673 = vrot.lane.b32.xlu1 %v3032_v24, %s2831_s12 }
 0xdf2   :  { %1313 = vrot.lane.b32.xlu1 %v1107_v23, %s2833_s14 }
 0xdf6   :  { %1315 = vrot.lane.b32.xlu1 %v1112_v22, %s2833_s14 }
 0xe5c   :  { %v2669_v25 = vpop.permute.xlu1 %2668 }
 0xe5d   :  { %v2671_v57 = vunpack.i.h.bf16 %v2669_v25  ;;  %v2670_v26 = vunpack.i.l.bf16 %v2669_v25 }
 0xe5f   :  { %v2576_v27 = vpack.c.bf16 %v2671_v57, %v2670_v26 }
 0xe60   :  { %v2674_v28 = vpop.permute.xlu1 %2673 }
 0xe61   :  { %v2676_v30 = vunpack.i.h.bf16 %v2674_v28  ;;  %v2675_v31 = vunpack.i.l.bf16 %v2674_v28  ;;  %2578 = vmatprep.subr.msk.bf16.mxu0 %vm2926_vm3, %v2576_v27 }
 0xe62   :  { %2581 = vmatpush3.bf16.xpose.msk.msra.mxu0 %vm2926_vm3, %v2576_v27 }
 0xe63   :  { %v2582_v33 = vpack.c.bf16 %v2676_v30, %v2675_v31 }
 0xe64   :  { %v1314_v60 = vpop.permute.xlu1 %1313 }
 0xe65   :  { %2583 = vmatprep.subr.bf16.mxu1 %v2582_v33 }
 0xe66   :  { %2585 = vmatpush3.bf16.msra.mxu1 %v2582_v33 }
 0xe68   :  { %v1316_v62 = vpop.permute.xlu1 %1315 }
 0xe69   :  { %2401 = vmatmul.mubr.msk.f32.vlgmr.msra.gmra.mrb[4].mxu0 %vm274_vm2, %v1112_v22 }
 0xf3c   :  { %v2402_v34 = vpop.f32.mrb[4].mxu0 }
 0xf3d   :  { %v1195_v35 = vpop.f32.mrb[5].mxu0  ;;  %v1201_v37 = vadd.f32 %v2402_v34, %v2935_v14 }
 0xf3e   :  { %v1196_v36 = vadd.f32 %v1195_v35, %v2937_v15 }
 0xf3f   :  { %v1207_v39 = vsel %vm274_vm2, %v1201_v37, -inf }
 0xf40   :  { %v1204_v38 = vsel %vm274_vm2, %v1196_v36, -inf }
 0xf41   :  { %1205 = vmax.xlane.f32.xlu0 %v1204_v38  ;;  %v1020_v38 = vld [vmem:[#allocation5 + $0x1e0] sm:$0xff] }
 0xf45   :  { %1208 = vmax.xlane.f32.xlu0 %v1207_v39 }
 0xfce   :  { %v1206_v40 = vpop.xlane.xlu0 %1205 }
 0xfcf   :  { %v1210_v41 = vsub.f32 %v1196_v36, %v1206_v40  ;;  %v1021_v40 = vld [vmem:[#allocation5 + $0x1e8] sm:$0xff] }
 0xfd1   :  { %v1212_v44 = vmul.f32 1.442695, %v1210_v41  ;;  %v1022_v41 = vld [vmem:[#allocation5 + $0x1f0] sm:$0xff] }
 0xfd2   :  { %v1209_v42 = vpop.xlane.xlu0 %1208 }
 0xfd3   :  { %v1211_v43 = vsub.f32 %v1201_v37, %v1209_v42  ;;  %v1019_v37 = vld [vmem:[#allocation5 + $0x1d8] sm:$0xff]  ;;  %v2600_v42 = vpack.c.bf16 %v1022_v41, %v1021_v40 }
 0xfd4   :  { %v2596_v39 = vpack.c.bf16 %v1020_v38, %v1019_v37  ;;  %v1651_v38 = vrot.slane %v3027_v19, %v805_v8 }
 0xfd5   :  { %v1214_v45 = vmul.f32 1.442695, %v1211_v43 }
 0xfd7   :  { %2713 = vpow2.f32 %v1214_v45 }
 0xfd8   :  { %2715 = vpow2.f32 %v1212_v44 }
 0xfe1   :  { %v2714_v46 = vpop.eup %2713 }
 0xfe2   :  { %v1219_v47 = vsel %vm274_vm2, %v2714_v46, 0.0  ;;  %v2716_v48 = vpop.eup %2715 }
 0xfe3   :  { %1220 = vadd.xlane.f32.xlu0 %v1219_v47  ;;  %v1216_v49 = vsel %vm274_vm2, %v2716_v48, 0.0 }
 0xfe7   :  { %1217 = vadd.xlane.f32.xlu0 %v1216_v49  ;;  %v1526_v49 = vrot.slane %v3027_v19, %v2976_v32 }
 0xffd   :  { %2678 = vrot.lane.b32.xlu0 %v3032_v24, %s2832_s13 }
0x1070   :  { %v1221_v50 = vpop.xlane.xlu0 %1220 }
0x1071   :  { %2717 = vrcp.f32 %v1221_v50 }
0x1074   :  { %v1218_v0 = vpop.xlane.xlu0 %1217 }
0x1075   :  { %2719 = vrcp.f32 %v1218_v0 }
0x1078   :  { %v2679_v61 = vpop.permute.xlu0 %2678 }
0x1079   :  { %v2681_v51 = vunpack.i.h.bf16 %v2679_v61  ;;  %v2680_v52 = vunpack.i.l.bf16 %v2679_v61 }
0x107b   :  { %v2586_v53 = vpack.c.bf16 %v2681_v51, %v2680_v52  ;;  %v2718_v54 = vpop.eup %2717 }
0x107c   :  { %v1225_v59 = vmul.f32 %v2718_v54, %v2714_v46 }
0x107d   :  { %2588 = vmatprep.subr.msk.bf16.mxu1 %vm2926_vm3, %v2586_v53 }
0x107f   :  { %v2720_v55 = vpop.eup %2719 }
0x1080   :  { %v1224_v58 = vmul.f32 %v2720_v55, %v2716_v48 }
0x1082   :  { %2407 = vmatprep.mubr.msk.f32.mxu1 %vm274_vm2, %v1224_v58 }
0x1083   :  { %2408 = vmatmul.mubr.msk.f32.vlgmr.msra.gmra.mrb[18].mxu1 %vm274_vm2, %v1225_v59 }
0x1084   :  { %2591 = vmatpush3.bf16.xpose.msk.msra.mxu1 %vm2926_vm3, %v2586_v53  ;;  %2414 = vmatprep.mubr.msk.f32.mxu1 %vm274_vm2, %v1314_v60 }
0x108b   :  { %2415 = vmatmul.mubr.msk.f32.vlgmr.msra.gmra.mrb[20].mxu1 %vm274_vm2, %v1316_v62 }
0x1156   :  { %v2409_v5 = vpop.f32.mrb[18].mxu1 }
0x1157   :  { %v1304_v6 = vpop.f32.mrb[19].mxu1 }
0x115e   :  { %v2416_v7 = vpop.f32.mrb[20].mxu1 }
0x115f   :  { %v1401_v9 = vadd.f32 %v2416_v7, %v2935_v14  ;;  %v1395_v10 = vpop.f32.mrb[21].mxu1 }
0x1160   :  { %v1396_v11 = vadd.f32 %v1395_v10, %v2937_v15 }
0x1161   :  { %v1407_v13 = vsel %vm274_vm2, %v1401_v9, -inf }
0x1162   :  { %1408 = vmax.xlane.f32.xlu0 %v1407_v13  ;;  %v1404_v16 = vsel %vm274_vm2, %v1396_v11, -inf }
0x1163   :  { %1405 = vmax.xlane.f32.xlu1 %v1404_v16  ;;  %v1025_v16 = vld [vmem:[#allocation5 + $0x208] sm:$0xff] }
0x1178   :  { %2683 = vrot.lane.b32.xlu0 %v3032_v24, %s2834_s15 }
0x11ef   :  { %v1409_v12 = vpop.xlane.xlu0 %1408 }
0x11f0   :  { %v1411_v20 = vsub.f32 %v1401_v9, %v1409_v12  ;;  %v1406_v21 = vpop.xlane.xlu1 %1405  ;;  %v1026_v12 = vld [vmem:[#allocation5 + $0x210] sm:$0xff] }
0x11f1   :  { %v1410_v22 = vsub.f32 %v1396_v11, %v1406_v21  ;;  %v1024_v11 = vld [vmem:[#allocation5 + $0x200] sm:$0xff] }
0x11f2   :  { %v1414_v2 = vmul.f32 1.442695, %v1411_v20  ;;  %v2608_v20 = vpack.c.bf16 %v1026_v12, %v1025_v16 }
0x11f3   :  { %v1412_v23 = vmul.f32 1.442695, %v1410_v22  ;;  %v2684_v25 = vpop.permute.xlu0 %2683 }
0x11f4   :  { %v2686_v14 = vunpack.i.h.bf16 %v2684_v25  ;;  %v2685_v57 = vunpack.i.l.bf16 %v2684_v25 }
0x11f5   :  { %2721 = vpow2.f32 %v1412_v23 }
0x11f6   :  { %v2592_v15 = vpack.c.bf16 %v2686_v14, %v2685_v57  ;;  %2723 = vpow2.f32 %v1414_v2  ;;  %v1639_v57 = vrot.slane %v3027_v19, %v2987_v3 }
0x11f8   :  { %2593 = vmatprep.subr.bf16.mxu0 %v2592_v15 }
0x11f9   :  { %2595 = vmatpush3.bf16.msra.mxu0 %v2592_v15 }
0x11fa   :  { %2597 = vmatprep.subr.bf16.mxu0 %v2596_v39 }
0x11ff   :  { %v2722_v26 = vpop.eup %2721 }
0x1200   :  { %v1416_v27 = vsel %vm274_vm2, %v2722_v26, 0.0  ;;  %v2724_v28 = vpop.eup %2723 }
0x1201   :  { %1417 = vadd.xlane.f32.xlu1 %v1416_v27  ;;  %v1419_v24 = vsel %vm274_vm2, %v2724_v28, 0.0  ;;  %v1645_v27 = vrot.slane %v3027_v19, %v799_v4 }
0x1205   :  { %1420 = vadd.xlane.f32.xlu1 %v1419_v24 }
0x128e   :  { %v1418_v30 = vpop.xlane.xlu1 %1417 }
0x128f   :  { %2725 = vrcp.f32 %v1418_v30 }
0x1292   :  { %v1421_v31 = vpop.xlane.xlu1 %1420 }
0x1293   :  { %2727 = vrcp.f32 %v1421_v31 }
0x1299   :  { %v2726_v33 = vpop.eup %2725 }
0x129a   :  { %v1424_v34 = vmul.f32 %v2726_v33, %v2722_v26 }
0x129c   :  { %2421 = vmatprep.mubr.msk.f32.mxu0 %vm274_vm2, %v1424_v34 }
0x129d   :  { %v2728_v35 = vpop.eup %2727 }
0x129e   :  { %v1425_v36 = vmul.f32 %v2728_v35, %v2724_v28  ;;  %v1027_v35 = vld [vmem:[#allocation5 + $0x218] sm:$0xff] }
0x12a0   :  { %2422 = vmatmul.mubr.msk.f32.vlgmr.msra.gmra.mrb[6].mxu0 %vm274_vm2, %v1425_v36  ;;  %v1028_v36 = vld [vmem:[#allocation5 + $0x220] sm:$0xff] }
0x12a1   :  { %2599 = vmatpush3.bf16.msra.mxu0 %v2596_v39  ;;  %v2612_v37 = vpack.c.bf16 %v1028_v36, %v1027_v35 }
0x12a2   :  { %2601 = vmatprep.subr.bf16.mxu0 %v2600_v42 }
0x12a5   :  { %2603 = vmatpush3.bf16.msra.mxu0 %v2600_v42 }
0x12a6   :  { %2613 = vmatprep.subr.bf16.mxu0 %v2612_v37 }
0x1373   :  { %v2423_v43 = vpop.f32.mrb[6].mxu0 }
0x1374   :  { %v1504_v44 = vpop.f32.mrb[7].mxu0 }
0x1375   :  { %1515 = vrot.lane.b32.xlu1 %v1504_v44, %s2824_s23  ;;  %v1738_v44 = vrot.slane %v3027_v19, %v892_v29 }
0x1379   :  { %1517 = vrot.lane.b32.xlu1 %v2423_v43, %s2824_s23 }
0x13e7   :  { %v1516_v45 = vpop.permute.xlu1 %1515 }
0x13e8   :  { %v1521_v46 = vsel %vm274_vm2, %v1304_v6, %v1516_v45 }
0x13e9   :  { %2432 = vmatprep.mubr.msk.f32.mxu0 %vm186_vm1, %v1521_v46 }
0x13eb   :  { %v1518_v47 = vpop.permute.xlu1 %1517 }
0x13ec   :  { %v1522_v48 = vsel %vm274_vm2, %v2409_v5, %v1518_v47 }
0x13ed   :  { %2433 = vmatmul.mubr.msk.f32.vlgmr.msra.gmra.mrb[8].mxu0 %vm186_vm1, %v1522_v48 }
0x13ee   :  { %2615 = vmatpush3.bf16.msra.mxu0 %v2612_v37 }
0x14c0   :  { %v2434_v50 = vpop.f32.mrb[8].mxu0 }
0x14c1   :  { %v1605_v0 = vadd.f32 %v2434_v50, %v1526_v49  ;;  %v1599_v61 = vpop.f32.mrb[9].mxu0 }
0x14c2   :  { %v1600_v51 = vadd.f32 %v1599_v61, %v1526_v49 }
0x14c3   :  { %v1609_v52 = vadd.f32 %v1605_v0, %v3021_v18 }
0x14c4   :  { %v1608_v53 = vadd.f32 %v1600_v51, %v3019_v17  ;;  %v1023_v17 = vld [vmem:[#allocation5 + $0x1f8] sm:$0xff] }
0x14c5   :  { %v1613_v54 = vsel %vm186_vm1, %v1609_v52, 0.0  ;;  %v2604_v13 = vpack.c.bf16 %v1024_v11, %v1023_v17 }
0x14c6   :  { %1614 = vadd.xlane.f32.xlu1 %v1613_v54  ;;  %v1610_v55 = vsel %vm186_vm1, %v1608_v53, 0.0 }
0x14c7   :  { %1611 = vadd.xlane.f32.xlu0 %v1610_v55  ;;  %2605 = vmatprep.subr.bf16.mxu1 %v2604_v13 }
0x14c8   :  { %2607 = vmatpush3.bf16.msra.mxu1 %v2604_v13 }
0x14c9   :  { %2609 = vmatprep.subr.bf16.mxu1 %v2608_v20 }
0x14cc   :  { %2611 = vmatpush3.bf16.msra.mxu1 %v2608_v20  ;;  %v1851_v20 = vrot.slane %v3027_v19, %v1005_v63 }
0x1553   :  { %v1615_v58 = vpop.xlane.xlu1 %1614 }
0x1554   :  { %v1617_v59 = vmul.f32 0.03125, %v1615_v58  ;;  %v1612_v60 = vpop.xlane.xlu0 %1611 }
0x1555   :  { %v1616_v62 = vmul.f32 0.03125, %v1612_v60 }
0x1556   :  { %v1619_v5 = vsub.f32 %v1609_v52, %v1617_v59 }
0x1557   :  { %v1618_v6 = vsub.f32 %v1608_v53, %v1616_v62  ;;  %v1860_v62 = vld [vmem:[#allocation5 + $0xe8] sm:$0xff] }
0x1558   :  { %v1621_v10 = vmul.f32 %v1619_v5, %v1619_v5 }
0x1559   :  { %v1620_v7 = vmul.f32 %v1618_v6, %v1618_v6 }
0x155a   :  { %v1625_v18 = vsel %vm186_vm1, %v1621_v10, 0.0 }
0x155b   :  { %v1622_v9 = vsel %vm186_vm1, %v1620_v7, 0.0  ;;  %v1862_v7 = vld [vmem:[#allocation5 + $0xf8] sm:$0xff] }
0x155c   :  { %1623 = vadd.xlane.f32.xlu0 %v1622_v9  ;;  %v1863_v9 = vld [vmem:[#allocation5 + $0x100] sm:$0xff] }
0x155d   :  { %v2620_v10 = vpack.c.bf16 %v1863_v9, %v1862_v7 }
0x1560   :  { %1626 = vadd.xlane.f32.xlu0 %v1625_v18 }
0x15e9   :  { %v1624_v21 = vpop.xlane.xlu0 %1623 }
0x15ea   :  { %v1628_v22 = vmul.f32 0.03125, %v1624_v21 }
0x15ec   :  { %v1630_v2 = vadd.f32 1e-05, %v1628_v22 }
0x15ed   :  { %v1627_v23 = vpop.xlane.xlu0 %1626 }
0x15ee   :  { %2729 = vrsqrt.f32 %v1630_v2  ;;  %v1629_v25 = vmul.f32 0.03125, %v1627_v23 }
0x15f0   :  { %v1631_v14 = vadd.f32 1e-05, %v1629_v25  ;;  %v1857_v25 = vrot.slane %v3027_v19, %v1011_v1 }
0x15f2   :  { %2731 = vrsqrt.f32 %v1631_v14 }
0x15f8   :  { %v2730_v15 = vpop.eup %2729 }
0x15f9   :  { %v1634_v26 = vmul.f32 %v2730_v15, %v1618_v6 }
0x15fb   :  { %v1640_v28 = vmul.f32 %v1639_v57, %v1634_v26 }
0x15fc   :  { %v2732_v24 = vpop.eup %2731 }
0x15fd   :  { %v1635_v30 = vmul.f32 %v2732_v24, %v1619_v5  ;;  %v1646_v31 = vadd.f32 %v1645_v27, %v1640_v28  ;;  %v1861_v5 = vld [vmem:[#allocation5 + $0xf0] sm:$0xff] }
0x15fe   :  { %v2616_v6 = vpack.c.bf16 %v1861_v5, %v1860_v62 }
0x15ff   :  { %v1641_v33 = vmul.f32 %v1639_v57, %v1635_v30  ;;  %2443 = vmatprep.mubr.msk.f32.mxu1 %vm186_vm1, %v1646_v31 }
0x1600   :  { %2617 = vmatprep.subr.bf16.mxu1 %v2616_v6 }
0x1601   :  { %v1647_v34 = vadd.f32 %v1645_v27, %v1641_v33  ;;  %v3112_v27 = vld [vmem:[#allocation5 + $0x118] sm:$0xff] }
0x1602   :  { %v1867_v63 = vrot.slane %v3112_v27, %v2976_v32 }
0x1603   :  { %2444 = vmatmul.mubr.msk.f32.vlgmr.msra.gmra.mrb[22].mxu1 %vm186_vm1, %v1647_v34 }
0x1604   :  { %2619 = vmatpush3.bf16.msra.mxu1 %v2616_v6 }
0x1605   :  { %2621 = vmatprep.subr.bf16.mxu1 %v2620_v10 }
0x1608   :  { %2623 = vmatpush3.bf16.msra.mxu1 %v2620_v10 }
0x16d6   :  { %v2445_v4 = vpop.f32.mrb[22].mxu1 }
0x16d7   :  { %v1730_v39 = vadd.f32 %v2445_v4, %v1651_v38  ;;  %v1724_v40 = vpop.f32.mrb[23].mxu1 }
0x16d8   :  { %v1725_v41 = vadd.f32 %v1724_v40, %v1651_v38 }
0x16d9   :  { %v1734_v43 = vmax.f32 %v1730_v39, 0.0 }
0x16da   :  { %v1733_v42 = vmax.f32 %v1725_v41, 0.0  ;;  %v1971_v41 = vld [vmem:[%s3153_s1] sm:$0xff] }
0x16dc   :  { %2450 = vmatprep.mubr.msk.f32.mxu0 %vm274_vm2, %v1733_v42  ;;  %v1972_v42 = vld [vmem:[%s3153_s1 + $0x8] sm:$0xff]  ;;  %s2836_s1 = smov [#allocation7]  }
0x16dd   :  { %2451 = vmatmul.mubr.msk.f32.vlgmr.msra.gmra.mrb[10].mxu0 %vm274_vm2, %v1734_v43  ;;  %v44_v43 = vld [vmem:[#allocation5 + $0x120] sm:$0xff]  ;;  %s2166_s20 = sshll.u32 %s2836_s1, 4  ;;  %s2167_s20 = int_to_ptr.vmem [resolvable:$true] %s2166_s20 }
0x16de   :  { %2468 = vmatprep.mubr.msk.f32.mxu0 %vm274_vm2, %v44_v43  ;;  %s2794_s21 = scalar_lea.vmem %s2167_s20, 256  ;;  %p2799_p3 = scmp.lt.s32.totalorder %s2167_s20, %s2167_s20 }
0x16df   :  { %p2795_p2 = scmp.ne.s32.totalorder %s2167_s20, %s2794_s21  ;;  %p2800_p4 = scmp.lt.s32.totalorder %s2794_s21, %s2794_s21 }
0x16e1   :  { %p2801_p5 = por %p2800_p4, %p2799_p3 }
0x16e3   :  { %p2802_p6 = pnand %p2801_p5, %p2795_p2 }
0x17b0   :  { %v2452_v45 = vpop.f32.mrb[10].mxu0 }
0x17b1   :  { %v1817_v46 = vadd.f32 %v2452_v45, %v1738_v44  ;;  %v1811_v47 = vpop.f32.mrb[11].mxu0 }
0x17b2   :  { %v1812_v48 = vadd.f32 %v1811_v47, %v1738_v44 }
0x17b3   :  { %v1821_v49 = vadd.f32 %v1817_v46, %v1647_v34 }
0x17b4   :  { %v1820_v8 = vadd.f32 %v1812_v48, %v1646_v31  ;;  %v2835_v31 = vmov 0  }
0x17b5   :  { %v1825_v50 = vsel %vm186_vm1, %v1821_v49, 0.0  ;;  %2688 = vset.pattern.permute.xlu0 %v2835_v31  ;;  %2687 = vset.pattern.permute.xlu1 %v2835_v31 }
0x17b6   :  { %1826 = vadd.xlane.f32.xlu0 %v1825_v50  ;;  %v1822_v0 = vsel %vm186_vm1, %v1820_v8, 0.0 }
0x17b7   :  { %1823 = vadd.xlane.f32.xlu1 %v1822_v0 }
0x1843   :  { %v1827_v61 = vpop.xlane.xlu0 %1826 }
0x1844   :  { %v1829_v51 = vmul.f32 0.03125, %v1827_v61  ;;  %v1824_v52 = vpop.xlane.xlu1 %1823 }
0x1845   :  { %v1828_v53 = vmul.f32 0.03125, %v1824_v52  ;;  %v45_v52 = vld [vmem:[#allocation5 + $0x128] sm:$0xff] }
0x1846   :  { %v1831_v54 = vsub.f32 %v1821_v49, %v1829_v51 }
0x1847   :  { %v1830_v55 = vsub.f32 %v1820_v8, %v1828_v53  ;;  %v2072_v53 = vld [vmem:[#allocation5 + $0x108] sm:$0xff] }
0x1848   :  { %v1833_v58 = vmul.f32 %v1831_v54, %v1831_v54 }
0x1849   :  { %v1832_v29 = vmul.f32 %v1830_v55, %v1830_v55 }
0x184a   :  { %v1837_v59 = vsel %vm186_vm1, %v1833_v58, 0.0 }
0x184b   :  { %1838 = vadd.xlane.f32.xlu0 %v1837_v59  ;;  %v1834_v60 = vsel %vm186_vm1, %v1832_v29, 0.0 }
0x184c   :  { %1835 = vadd.xlane.f32.xlu1 %v1834_v60 }
0x18d8   :  { %v1839_v18 = vpop.xlane.xlu0 %1838 }
0x18d9   :  { %v1841_v17 = vmul.f32 0.03125, %v1839_v18  ;;  %v1836_v11 = vpop.xlane.xlu1 %1835  ;;  %v2077_v18 = vrot.slane %v3112_v27, %v2987_v3 }
0x18da   :  { %v1840_v13 = vmul.f32 0.03125, %v1836_v11 }
0x18db   :  { %v1843_v16 = vadd.f32 1e-05, %v1841_v17 }
0x18dc   :  { %v1842_v12 = vadd.f32 1e-05, %v1840_v13 }
0x18dd   :  { %2733 = vrsqrt.f32 %v1843_v16 }
0x18de   :  { %2735 = vrsqrt.f32 %v1842_v12 }
0x18e7   :  { %v2734_v21 = vpop.eup %2733 }
0x18e8   :  { %v2736_v22 = vpop.eup %2735  ;;  %v1847_v2 = vmul.f32 %v2734_v21, %v1831_v54  ;;  %v2073_v54 = vld [vmem:[#allocation5 + $0x110] sm:$0xff] }
0x18e9   :  { %v1846_v23 = vmul.f32 %v2736_v22, %v1830_v55  ;;  %v2628_v55 = vpack.c.bf16 %v2073_v54, %v2072_v53 }
0x18ea   :  { %v1853_v14 = vmul.f32 %v1851_v20, %v1847_v2 }
0x18eb   :  { %v1852_v57 = vmul.f32 %v1851_v20, %v1846_v23 }
0x18ec   :  { %v1859_v26 = vadd.f32 %v1857_v25, %v1853_v14 }
0x18ed   :  { %v1858_v15 = vadd.f32 %v1857_v25, %v1852_v57 }
0x18ef   :  { %2461 = vmatprep.mubr.msk.f32.mxu1 %vm186_vm1, %v1858_v15 }
0x18f0   :  { %2462 = vmatmul.mubr.msk.f32.vlgmr.msra.gmra.mrb[24].mxu1 %vm186_vm1, %v1859_v26 }
0x19c3   :  { %v2463_v28 = vpop.f32.mrb[24].mxu1 }
0x19c4   :  { %v3116_v24 = vadd.f32 %v2463_v28, %v1867_v63  ;;  %v1940_v30 = vpop.f32.mrb[25].mxu1 }
0x19c5   :  { %v1941_v56 = vadd.f32 %v1940_v30, %v1867_v63 }
0x19c6   :  { %v1952_v1 = vsel %vm274_vm2, %v3116_v24, -inf }
0x19c7   :  { %1953 = vmax.xlane.f32.xlu0 %v1952_v1  ;;  %v1949_v19 = vsel %vm274_vm2, %v1941_v56, -inf }
0x19c8   :  { %1950 = vmax.xlane.f32.xlu1 %v1949_v19 }
0x1a54   :  { %v1954_v33 = vpop.xlane.xlu0 %1953 }
0x1a55   :  { %v1956_v34 = vsub.f32 %v3116_v24, %v1954_v33  ;;  %v1951_v35 = vpop.xlane.xlu1 %1950 }
0x1a56   :  { %v1955_v32 = vsub.f32 %v1941_v56, %v1951_v35 }
0x1a57   :  { %v1959_v36 = vmul.f32 1.442695, %v1956_v34 }
0x1a58   :  { %v1957_v37 = vmul.f32 1.442695, %v1955_v32 }
0x1a59   :  { %2737 = vpow2.f32 %v1959_v36 }
0x1a5a   :  { %2739 = vpow2.f32 %v1957_v37 }
0x1a63   :  { %v2738_v38 = vpop.eup %2737 }
0x1a64   :  { %v2740_v4 = vpop.eup %2739  ;;  %v1964_v39 = vsel %vm274_vm2, %v2738_v38, 0.0 }
0x1a65   :  { %1965 = vadd.xlane.f32.xlu0 %v1964_v39  ;;  %v1961_v40 = vsel %vm274_vm2, %v2740_v4, 0.0 }
0x1a66   :  { %1962 = vadd.xlane.f32.xlu1 %v1961_v40 }
0x1a77   :  { %1975 = vperm.xlu1 %2687, %v1971_v41  }
0x1a7b   :  { %1980 = vperm.xlu0 %2688, %v1972_v42  }
0x1af2   :  { %v1966_v44 = vpop.xlane.xlu0 %1965 }
0x1af3   :  { %2741 = vrcp.f32 %v1966_v44  ;;  %v1963_v45 = vpop.xlane.xlu1 %1962 }
0x1af4   :  { %2743 = vrcp.f32 %v1963_v45 }
0x1af7   :  { %v1976_v8 = vpop.permute.xlu1 %1975 }
0x1afa   :  { %v1981_v47 = vpop.permute.xlu0 %1980 }
0x1afd   :  { %v2742_v46 = vpop.eup %2741 }
0x1afe   :  { %v2744_v48 = vpop.eup %2743  ;;  %v1970_v49 = vmul.f32 %v2742_v46, %v2738_v38 }
0x1aff   :  { %v1969_v50 = vmul.f32 %v2744_v48, %v2740_v4 }
0x1b00   :  { %v1984_v0 = vmul.f32 %v1981_v47, %v1970_v49 }
0x1b01   :  { %v1983_v61 = vmul.f32 %v1976_v8, %v1969_v50 }
0x1b03   :  { %v2624_v51 = vpack.c.bf16 %v1984_v0, %v1983_v61 }
0x1b05   :  { %2625 = vmatprep.subr.bf16.mxu0 %v2624_v51 }
0x1b06   :  { %2627 = vmatpush3.bf16.msra.mxu0 %v2624_v51 }
0x1b07   :  { %2629 = vmatprep.subr.bf16.mxu0 %v2628_v55 }
0x1b09   :  { %2469 = vmatmul.mubr.msk.f32.vlgmr.msra.gmra.mrb[12].mxu0 %vm274_vm2, %v45_v52 }
0x1b0a   :  { %2631 = vmatpush3.bf16.msra.mxu0 %v2628_v55 }
0x1bdc   :  { %v2470_v58 = vpop.f32.mrb[12].mxu0 }
0x1bdd   :  { %v2063_v29 = vadd.f32 1e-08, %v2470_v58  ;;  %v2057_v59 = vpop.f32.mrb[13].mxu0 }
0x1bde   :  { %v2058_v60 = vadd.f32 1e-08, %v2057_v59 }
0x1bdf   :  { %2745 = vrcp.f32 %v2063_v29 }
0x1be0   :  { %2747 = vrcp.f32 %v2058_v60 }
0x1be9   :  { %v2746_v62 = vpop.eup %2745 }
0x1bea   :  { %v2748_v5 = vpop.eup %2747  ;;  %v2069_v6 = vmul.f32 %v2746_v62, %v1984_v0 }
0x1beb   :  { %v2068_v7 = vmul.f32 %v2748_v5, %v1983_v61 }
0x1bec   :  { %v2071_v10 = vmul.f32 %v2069_v6, %v3116_v24 }
0x1bed   :  { %v2070_v9 = vmul.f32 %v2068_v7, %v1941_v56 }
0x1bef   :  { %2475 = vmatprep.mubr.msk.f32.mxu0 %vm274_vm2, %v2070_v9 }
0x1bf0   :  { %2476 = vmatmul.mubr.msk.f32.vlgmr.msra.gmra.mrb[14].mxu0 %vm274_vm2, %v2071_v10 }
0x1cc3   :  { %v2477_v17 = vpop.f32.mrb[14].mxu0 }
0x1cc4   :  { %v2156_v11 = vadd.f32 %v2477_v17, %v2077_v18  ;;  %v2150_v13 = vpop.f32.mrb[15].mxu0 }
0x1cc5   :  { %v2151_v16 = vadd.f32 %v2150_v13, %v2077_v18 }
0x1cc6   :  { %2160 = vst [vmem:[#allocation7 + $0x8] sm:$0xff] %v2156_v11 }
0x1cc7   :  { %2159 = vst [vmem:[#allocation7] sm:$0xff] %v2151_v16 }
0x1cc8   :  { %2805 = shalt.err (!%p2802_p6)
}
0x1cc9   :  { %s2806_s24 = scalar_lea.hbm %s3155_s3, 256 }
0x1cca   :  { %p2807_p7 = scmp.ne.s32.totalorder %s3155_s3, %s2806_s24  ;;  %p2810_p8 = scmp.lt.u32.totalorder %s2806_s24, %s3155_s3 }
0x1ccc   :  { %p2812_p9 = pnand %p2810_p8, %p2807_p7 }
0x1cce   :  { %2815 = shalt.err (!%p2812_p9)
}
0x1ccf   :  { %2172 = dma.vmem_to_hbm [thread:$0]  %s2167_s20, 256, %s3155_s3, [#allocation4], %s2826_s0, %s2826_s0, %s2827_s9  }
0x1cd0   :  { %2820 = dma.done.wait [#allocation4], 256  }
0x1cd1   :  { %2821 = vsyncadd [#allocation4], 4294967040 }
0x1cd2   :  { %2176 = vsyncpa [#allocation3], 1 }
0x1cd3   :  { %2177 = vsyncpa [#allocation6], 1 }
0x1cd4   :  { %2178 = vsyncpa [#allocation4], 1 }

</bundles_post_ra>
